<compile_context>
chip_gen: v7x
topology: tpu7x:2x2x1
jax: 0.10.0
libtpu: 0.0.40
codegen_flags: <defaults>
</compile_context>

<pallas_src>
import functools

import numpy as np
import jax
import jax.numpy as jnp
from jax.experimental import pallas as pl
from jax.experimental.pallas import tpu as pltpu

_LANES = 128
_KTAPS = 5          # 5x5x5 fused receptive field
_ROW_STRIP = 128    # max output rows accumulated in registers at once


def _round_up(a, b):
    return ((a + b - 1) // b) * b


# ----------------------------- Pallas kernel -----------------------------

def _dilated_block_kernel(x0, x1, x2, x3, x4, w_ref, b_ref, o_ref, *,
                          w, hw, strip):
    # x{kd}: (Hp*W, 5*Cin) bf16 -- padded depth slice d+kd, kw taps folded into
    #                              the channel (lane) dim.
    # w_ref: (5, 5, 5*Cin, Cp) bf16 -- fused weight, VMEM resident.
    # b_ref: (1, Cp)          f32  -- fused bias.
    # o_ref: (H*W, Cp)        f32  -- output block for grid point (n, d).
    xs = (x0, x1, x2, x3, x4)
    cp = o_ref.shape[1]
    for m0 in range(0, hw, strip):                      # bound register pressure
        acc = jnp.zeros((strip, cp), jnp.float32)
        for kd in range(_KTAPS):
            for kh in range(_KTAPS):
                # Contiguous rows [kh*W + m0, kh*W + m0 + strip): these are the
                # H-shifted (by kh) spatial positions for this row strip.
                a = xs[kd][pl.ds(kh * w + m0, strip), :]
                acc = acc + jnp.dot(a, w_ref[kd, kh],
                                    preferred_element_type=jnp.float32)
        o_ref[pl.ds(m0, strip), :] = acc + b_ref[...]


# ----------------------------- wrapper glue -----------------------------

def _fuse_weights(params, cin):
    """Embed the 4 conv kernels into one (5,5,5,Cin,Cout) weight + fused bias."""
    c4 = cin // 4
    cout = 4 * c4
    wf = jnp.zeros((5, 5, 5, cin, cout), jnp.float32)
    wf = wf.at[2, 2, 2, :, 0:c4].set(params["w1"][0, 0, 0])              # 1x1x1 center tap
    wf = wf.at[1:4, 1:4, 1:4, :, c4:2 * c4].set(params["w2"])            # 3x3x3, pad 1
    wf = wf.at[:, :, :, :, 2 * c4:3 * c4].set(params["w3"])              # 5x5x5, pad 2
    wf = wf.at[0:5:2, 0:5:2, 0:5:2, :, 3 * c4:4 * c4].set(params["w4"])  # 3x3x3 dil 2
    bf = jnp.concatenate([params["b1"], params["b2"], params["b3"], params["b4"]])
    return wf, bf


def _slab_index_map(i):
    def im(nn, dd):
        return (nn, dd + i, 0, 0)   # depth slice d + kd(=i)
    return im


def dilated_conv_block_forward(params, x_ncdhw):
    """Fused DilatedConvBlock forward.  x: (N, Cin, D, H, W) f32 -> (N, Cout, D, H, W)."""
    n, cin, d, h, w = x_ncdhw.shape
    assert cin % 4 == 0, "DilatedConvBlock channel math assumes in_channels % 4 == 0"
    c4 = cin // 4
    cout = 4 * c4
    cp = _round_up(cout, _LANES)
    dp, hp = d + 4, h + 4
    hw = h * w
    kc = _KTAPS * cin

    # NCDHW -> NDHWC, cast to bf16 BEFORE any expansion.
    x = jnp.transpose(x_ncdhw, (0, 2, 3, 4, 1)).astype(jnp.bfloat16)

    # Zero-pad D, H, W by 2.  D/H halos are consumed via index_map / in-kernel
    # row slices; the W halo is folded right here into the channel dim (5x).
    xp = jnp.pad(x, ((0, 0), (2, 2), (2, 2), (2, 2), (0, 0)))
    slab = jnp.concatenate([xp[:, :, :, kw:kw + w, :] for kw in range(_KTAPS)],
                           axis=-1)                       # (N, Dp, Hp, W, 5*Cin)
    slab = slab.reshape(n, dp, hp * w, kc)                # (N, Dp, Hp*W, 5*Cin) bf16

    # Fused weight: (5,5,5,Cin,Cout) -> (kd, kh, kw*Cin+ci, Cp) bf16 (K order
    # matches the kw-fold above); fused bias (1, Cp) f32.
    wf, bf = _fuse_weights(params, cin)
    wk = wf.reshape(_KTAPS, _KTAPS, _KTAPS * cin, cout)
    wk = jnp.pad(wk, ((0, 0), (0, 0), (0, 0), (0, cp - cout))).astype(jnp.bfloat16)
    bias = jnp.pad(bf, (0, cp - cout)).astype(jnp.float32).reshape(1, cp)

    strip = hw if hw <= _ROW_STRIP else _ROW_STRIP
    assert hw % strip == 0, "H*W must be a multiple of the register row strip"

    kernel = functools.partial(_dilated_block_kernel, w=w, hw=hw, strip=strip)

    out = pl.pallas_call(
        kernel,
        out_shape=jax.ShapeDtypeStruct((n, d, hw, cp), jnp.float32),
        grid=(n, d),
        in_specs=(
            # Five views of the SAME slab: depth slices d+0 .. d+4 (kd halo).
            [pl.BlockSpec((None, None, hp * w, kc), _slab_index_map(i))
             for i in range(_KTAPS)]
            + [
                pl.BlockSpec((_KTAPS, _KTAPS, kc, cp), lambda nn, dd: (0, 0, 0, 0)),
                pl.BlockSpec((1, cp), lambda nn, dd: (0, 0)),
            ]
        ),
        out_specs=pl.BlockSpec((None, None, hw, cp), lambda nn, dd: (nn, dd, 0, 0)),
        compiler_params=pltpu.CompilerParams(
            dimension_semantics=("parallel", "parallel"),
            vmem_limit_bytes=32 * 1024 * 1024),
    )(slab, slab, slab, slab, slab, wk, bias)

    y = out[..., :cout].reshape(n, d, h, w, cout)
    return jnp.transpose(y, (0, 4, 1, 2, 3))              # back to NCDHW


# ----------------------------- parameters -----------------------------

def init_params(key, in_channels):
    """Deterministic synthetic parameters matching the PyTorch module's shapes (DHWIO)."""
    c4 = in_channels // 4
    ks = jax.random.split(key, 8)
    return {
        "w1": 0.1 * jax.random.normal(ks[0], (1, 1, 1, in_channels, c4), jnp.float32),
        "w2": 0.1 * jax.random.normal(ks[1], (3, 3, 3, in_channels, c4), jnp.float32),
        "w3": 0.1 * jax.random.normal(ks[2], (5, 5, 5, in_channels, c4), jnp.float32),
        "w4": 0.1 * jax.random.normal(ks[3], (3, 3, 3, in_channels, c4), jnp.float32),
        "b1": 0.1 * jax.random.normal(ks[4], (c4,), jnp.float32),
        "b2": 0.1 * jax.random.normal(ks[5], (c4,), jnp.float32),
        "b3": 0.1 * jax.random.normal(ks[6], (c4,), jnp.float32),
        "b4": 0.1 * jax.random.normal(ks[7], (c4,), jnp.float32),
    }


# ----------------------------- pure-JAX reference -----------------------------

def _conv_ref(x, wgt, bias, pad, dil):
    y = jax.lax.conv_general_dilated(
        x, wgt, window_strides=(1, 1, 1),
        padding=[(pad, pad)] * 3,
        rhs_dilation=(dil, dil, dil),
        dimension_numbers=("NDHWC", "DHWIO", "NDHWC"),
        precision=jax.lax.Precision.HIGHEST)
    return y + bias


def dilated_conv_block_ref(params, x_ncdhw):
    """Reference on bf16-rounded operands (matches MXU bf16 x bf16 -> f32 math)."""
    x = jnp.transpose(x_ncdhw, (0, 2, 3, 4, 1)).astype(jnp.float32)
    xr = x.astype(jnp.bfloat16).astype(jnp.float32)
    rw = lambda a: a.astype(jnp.bfloat16).astype(jnp.float32)
    y1 = _conv_ref(xr, rw(params["w1"]), params["b1"], pad=0, dil=1)
    y2 = _conv_ref(xr, rw(params["w2"]), params["b2"], pad=1, dil=1)
    y3 = _conv_ref(xr, rw(params["w3"]), params["b3"], pad=2, dil=1)
    y4 = _conv_ref(xr, rw(params["w4"]), params["b4"], pad=2, dil=2)
    y = jnp.concatenate([y1, y2, y3, y4], axis=-1)
    return jnp.transpose(y, (0, 4, 1, 2, 3))


# ----------------------------- main -----------------------------

if __name__ == "__main__":
    key = jax.random.PRNGKey(0)
    in_channels = 16            # Cout = 4 * (in_channels // 4) = 16
    N, D, H, W = 2, 8, 8, 8

    kx, kp = jax.random.split(key)
    x = jax.random.normal(kx, (N, in_channels, D, H, W), jnp.float32)
    params = init_params(kp, in_channels)

    fwd = jax.jit(dilated_conv_block_forward)
    out = jax.block_until_ready(fwd(params, x))
    assert out.shape == (N, in_channels, D, H, W), out.shape

    ref = jax.block_until_ready(dilated_conv_block_ref(params, x))
    np.testing.assert_allclose(np.asarray(out), np.asarray(ref), rtol=1e-3, atol=1e-3)

    print("KERNEL_OK")
</pallas_src>

<mosaic_0001>
module attributes {stable_mosaic.version = 11 : i64} {
  func.func @_dilated_block_kernel(%arg0: i32, %arg1: i32, %arg2: memref<1x1x96x80xbf16, #tpu.memory_space<vmem>>, %arg3: memref<1x1x96x80xbf16, #tpu.memory_space<vmem>>, %arg4: memref<1x1x96x80xbf16, #tpu.memory_space<vmem>>, %arg5: memref<1x1x96x80xbf16, #tpu.memory_space<vmem>>, %arg6: memref<1x1x96x80xbf16, #tpu.memory_space<vmem>>, %arg7: memref<5x5x80x128xbf16, #tpu.memory_space<vmem>>, %arg8: memref<1x128xf32, #tpu.memory_space<vmem>>, %arg9: memref<1x1x64x128xf32, #tpu.memory_space<vmem>>) attributes {dimension_semantics = [#tpu.dimension_semantics<parallel>, #tpu.dimension_semantics<parallel>], iteration_bounds = array<i64: 2, 8>, scalar_prefetch = 0 : i64, scratch_operands = 0 : i64, tpu.core_type = #tpu.core_type<tc>, window_params = [{transform_indices = @transform_0, window_bounds = array<i64: 1, 1, 96, 80>}, {transform_indices = @transform_1, window_bounds = array<i64: 1, 1, 96, 80>}, {transform_indices = @transform_2, window_bounds = array<i64: 1, 1, 96, 80>}, {transform_indices = @transform_3, window_bounds = array<i64: 1, 1, 96, 80>}, {transform_indices = @transform_4, window_bounds = array<i64: 1, 1, 96, 80>}, {pipeline_mode = #tpu.pipeline_mode<synchronous>, transform_indices = @transform_5, window_bounds = array<i64: 5, 5, 80, 128>}, {pipeline_mode = #tpu.pipeline_mode<synchronous>, transform_indices = @transform_6, window_bounds = array<i64: 1, 128>}, {transform_indices = @transform_7, window_bounds = array<i64: 1, 1, 64, 128>}]} {
    %cst = arith.constant 0.000000e+00 : f32
    %0 = vector.broadcast %cst : f32 to vector<64x128xf32>
    %c0 = arith.constant 0 : index
    %c0_0 = arith.constant 0 : index
    %c0_1 = arith.constant 0 : index
    %c0_2 = arith.constant 0 : index
    %1 = vector.load %arg2[%c0, %c0_0, %c0_1, %c0_2] : memref<1x1x96x80xbf16, #tpu.memory_space<vmem>>, vector<1x1x64x80xbf16>
    %2 = vector.shape_cast %1 : vector<1x1x64x80xbf16> to vector<64x80xbf16>
    %c0_3 = arith.constant 0 : index
    %c0_4 = arith.constant 0 : index
    %c0_5 = arith.constant 0 : index
    %c0_6 = arith.constant 0 : index
    %3 = vector.load %arg7[%c0_3, %c0_4, %c0_5, %c0_6] : memref<5x5x80x128xbf16, #tpu.memory_space<vmem>>, vector<1x1x80x128xbf16>
    %4 = vector.shape_cast %3 : vector<1x1x80x128xbf16> to vector<80x128xbf16>
    %cst_7 = arith.constant dense<0.000000e+00> : vector<64x128xf32>
    %5 = tpu.matmul %2, %4, %cst_7 {dimension_numbers = #tpu.dot_dimension_numbers<[1], [0], [0], [1], [0, 0, 1, 1], [], []>} : vector<64x80xbf16>, vector<80x128xbf16>, vector<64x128xf32> -> vector<64x128xf32>
    %6 = arith.addf %0, %5 : vector<64x128xf32>
    %c0_8 = arith.constant 0 : index
    %c0_9 = arith.constant 0 : index
    %c8 = arith.constant 8 : index
    %c0_10 = arith.constant 0 : index
    %7 = vector.load %arg2[%c0_8, %c0_9, %c8, %c0_10] : memref<1x1x96x80xbf16, #tpu.memory_space<vmem>>, vector<1x1x64x80xbf16>
    %8 = vector.shape_cast %7 : vector<1x1x64x80xbf16> to vector<64x80xbf16>
    %c0_11 = arith.constant 0 : index
    %c1 = arith.constant 1 : index
    %c0_12 = arith.constant 0 : index
    %c0_13 = arith.constant 0 : index
    %9 = vector.load %arg7[%c0_11, %c1, %c0_12, %c0_13] : memref<5x5x80x128xbf16, #tpu.memory_space<vmem>>, vector<1x1x80x128xbf16>
    %10 = vector.shape_cast %9 : vector<1x1x80x128xbf16> to vector<80x128xbf16>
    %cst_14 = arith.constant dense<0.000000e+00> : vector<64x128xf32>
    %11 = tpu.matmul %8, %10, %cst_14 {dimension_numbers = #tpu.dot_dimension_numbers<[1], [0], [0], [1], [0, 0, 1, 1], [], []>} : vector<64x80xbf16>, vector<80x128xbf16>, vector<64x128xf32> -> vector<64x128xf32>
    %12 = arith.addf %6, %11 : vector<64x128xf32>
    %c0_15 = arith.constant 0 : index
    %c0_16 = arith.constant 0 : index
    %c16 = arith.constant 16 : index
    %c0_17 = arith.constant 0 : index
    %13 = vector.load %arg2[%c0_15, %c0_16, %c16, %c0_17] : memref<1x1x96x80xbf16, #tpu.memory_space<vmem>>, vector<1x1x64x80xbf16>
    %14 = vector.shape_cast %13 : vector<1x1x64x80xbf16> to vector<64x80xbf16>
    %c0_18 = arith.constant 0 : index
    %c2 = arith.constant 2 : index
    %c0_19 = arith.constant 0 : index
    %c0_20 = arith.constant 0 : index
    %15 = vector.load %arg7[%c0_18, %c2, %c0_19, %c0_20] : memref<5x5x80x128xbf16, #tpu.memory_space<vmem>>, vector<1x1x80x128xbf16>
    %16 = vector.shape_cast %15 : vector<1x1x80x128xbf16> to vector<80x128xbf16>
    %cst_21 = arith.constant dense<0.000000e+00> : vector<64x128xf32>
    %17 = tpu.matmul %14, %16, %cst_21 {dimension_numbers = #tpu.dot_dimension_numbers<[1], [0], [0], [1], [0, 0, 1, 1], [], []>} : vector<64x80xbf16>, vector<80x128xbf16>, vector<64x128xf32> -> vector<64x128xf32>
    %18 = arith.addf %12, %17 : vector<64x128xf32>
    %c0_22 = arith.constant 0 : index
    %c0_23 = arith.constant 0 : index
    %c24 = arith.constant 24 : index
    %c0_24 = arith.constant 0 : index
    %19 = vector.load %arg2[%c0_22, %c0_23, %c24, %c0_24] : memref<1x1x96x80xbf16, #tpu.memory_space<vmem>>, vector<1x1x64x80xbf16>
    %20 = vector.shape_cast %19 : vector<1x1x64x80xbf16> to vector<64x80xbf16>
    %c0_25 = arith.constant 0 : index
    %c3 = arith.constant 3 : index
    %c0_26 = arith.constant 0 : index
    %c0_27 = arith.constant 0 : index
    %21 = vector.load %arg7[%c0_25, %c3, %c0_26, %c0_27] : memref<5x5x80x128xbf16, #tpu.memory_space<vmem>>, vector<1x1x80x128xbf16>
    %22 = vector.shape_cast %21 : vector<1x1x80x128xbf16> to vector<80x128xbf16>
    %cst_28 = arith.constant dense<0.000000e+00> : vector<64x128xf32>
    %23 = tpu.matmul %20, %22, %cst_28 {dimension_numbers = #tpu.dot_dimension_numbers<[1], [0], [0], [1], [0, 0, 1, 1], [], []>} : vector<64x80xbf16>, vector<80x128xbf16>, vector<64x128xf32> -> vector<64x128xf32>
    %24 = arith.addf %18, %23 : vector<64x128xf32>
    %c0_29 = arith.constant 0 : index
    %c0_30 = arith.constant 0 : index
    %c32 = arith.constant 32 : index
    %c0_31 = arith.constant 0 : index
    %25 = vector.load %arg2[%c0_29, %c0_30, %c32, %c0_31] : memref<1x1x96x80xbf16, #tpu.memory_space<vmem>>, vector<1x1x64x80xbf16>
    %26 = vector.shape_cast %25 : vector<1x1x64x80xbf16> to vector<64x80xbf16>
    %c0_32 = arith.constant 0 : index
    %c4 = arith.constant 4 : index
    %c0_33 = arith.constant 0 : index
    %c0_34 = arith.constant 0 : index
    %27 = vector.load %arg7[%c0_32, %c4, %c0_33, %c0_34] : memref<5x5x80x128xbf16, #tpu.memory_space<vmem>>, vector<1x1x80x128xbf16>
    %28 = vector.shape_cast %27 : vector<1x1x80x128xbf16> to vector<80x128xbf16>
    %cst_35 = arith.constant dense<0.000000e+00> : vector<64x128xf32>
    %29 = tpu.matmul %26, %28, %cst_35 {dimension_numbers = #tpu.dot_dimension_numbers<[1], [0], [0], [1], [0, 0, 1, 1], [], []>} : vector<64x80xbf16>, vector<80x128xbf16>, vector<64x128xf32> -> vector<64x128xf32>
    %30 = arith.addf %24, %29 : vector<64x128xf32>
    %c0_36 = arith.constant 0 : index
    %c0_37 = arith.constant 0 : index
    %c0_38 = arith.constant 0 : index
    %c0_39 = arith.constant 0 : index
    %31 = vector.load %arg3[%c0_36, %c0_37, %c0_38, %c0_39] : memref<1x1x96x80xbf16, #tpu.memory_space<vmem>>, vector<1x1x64x80xbf16>
    %32 = vector.shape_cast %31 : vector<1x1x64x80xbf16> to vector<64x80xbf16>
    %c1_40 = arith.constant 1 : index
    %c0_41 = arith.constant 0 : index
    %c0_42 = arith.constant 0 : index
    %c0_43 = arith.constant 0 : index
    %33 = vector.load %arg7[%c1_40, %c0_41, %c0_42, %c0_43] : memref<5x5x80x128xbf16, #tpu.memory_space<vmem>>, vector<1x1x80x128xbf16>
    %34 = vector.shape_cast %33 : vector<1x1x80x128xbf16> to vector<80x128xbf16>
    %cst_44 = arith.constant dense<0.000000e+00> : vector<64x128xf32>
    %35 = tpu.matmul %32, %34, %cst_44 {dimension_numbers = #tpu.dot_dimension_numbers<[1], [0], [0], [1], [0, 0, 1, 1], [], []>} : vector<64x80xbf16>, vector<80x128xbf16>, vector<64x128xf32> -> vector<64x128xf32>
    %36 = arith.addf %30, %35 : vector<64x128xf32>
    %c0_45 = arith.constant 0 : index
    %c0_46 = arith.constant 0 : index
    %c8_47 = arith.constant 8 : index
    %c0_48 = arith.constant 0 : index
    %37 = vector.load %arg3[%c0_45, %c0_46, %c8_47, %c0_48] : memref<1x1x96x80xbf16, #tpu.memory_space<vmem>>, vector<1x1x64x80xbf16>
    %38 = vector.shape_cast %37 : vector<1x1x64x80xbf16> to vector<64x80xbf16>
    %c1_49 = arith.constant 1 : index
    %c1_50 = arith.constant 1 : index
    %c0_51 = arith.constant 0 : index
    %c0_52 = arith.constant 0 : index
    %39 = vector.load %arg7[%c1_49, %c1_50, %c0_51, %c0_52] : memref<5x5x80x128xbf16, #tpu.memory_space<vmem>>, vector<1x1x80x128xbf16>
    %40 = vector.shape_cast %39 : vector<1x1x80x128xbf16> to vector<80x128xbf16>
    %cst_53 = arith.constant dense<0.000000e+00> : vector<64x128xf32>
    %41 = tpu.matmul %38, %40, %cst_53 {dimension_numbers = #tpu.dot_dimension_numbers<[1], [0], [0], [1], [0, 0, 1, 1], [], []>} : vector<64x80xbf16>, vector<80x128xbf16>, vector<64x128xf32> -> vector<64x128xf32>
    %42 = arith.addf %36, %41 : vector<64x128xf32>
    %c0_54 = arith.constant 0 : index
    %c0_55 = arith.constant 0 : index
    %c16_56 = arith.constant 16 : index
    %c0_57 = arith.constant 0 : index
    %43 = vector.load %arg3[%c0_54, %c0_55, %c16_56, %c0_57] : memref<1x1x96x80xbf16, #tpu.memory_space<vmem>>, vector<1x1x64x80xbf16>
    %44 = vector.shape_cast %43 : vector<1x1x64x80xbf16> to vector<64x80xbf16>
    %c1_58 = arith.constant 1 : index
    %c2_59 = arith.constant 2 : index
    %c0_60 = arith.constant 0 : index
    %c0_61 = arith.constant 0 : index
    %45 = vector.load %arg7[%c1_58, %c2_59, %c0_60, %c0_61] : memref<5x5x80x128xbf16, #tpu.memory_space<vmem>>, vector<1x1x80x128xbf16>
    %46 = vector.shape_cast %45 : vector<1x1x80x128xbf16> to vector<80x128xbf16>
    %cst_62 = arith.constant dense<0.000000e+00> : vector<64x128xf32>
    %47 = tpu.matmul %44, %46, %cst_62 {dimension_numbers = #tpu.dot_dimension_numbers<[1], [0], [0], [1], [0, 0, 1, 1], [], []>} : vector<64x80xbf16>, vector<80x128xbf16>, vector<64x128xf32> -> vector<64x128xf32>
    %48 = arith.addf %42, %47 : vector<64x128xf32>
    %c0_63 = arith.constant 0 : index
    %c0_64 = arith.constant 0 : index
    %c24_65 = arith.constant 24 : index
    %c0_66 = arith.constant 0 : index
    %49 = vector.load %arg3[%c0_63, %c0_64, %c24_65, %c0_66] : memref<1x1x96x80xbf16, #tpu.memory_space<vmem>>, vector<1x1x64x80xbf16>
    %50 = vector.shape_cast %49 : vector<1x1x64x80xbf16> to vector<64x80xbf16>
    %c1_67 = arith.constant 1 : index
    %c3_68 = arith.constant 3 : index
    %c0_69 = arith.constant 0 : index
    %c0_70 = arith.constant 0 : index
    %51 = vector.load %arg7[%c1_67, %c3_68, %c0_69, %c0_70] : memref<5x5x80x128xbf16, #tpu.memory_space<vmem>>, vector<1x1x80x128xbf16>
    %52 = vector.shape_cast %51 : vector<1x1x80x128xbf16> to vector<80x128xbf16>
    %cst_71 = arith.constant dense<0.000000e+00> : vector<64x128xf32>
    %53 = tpu.matmul %50, %52, %cst_71 {dimension_numbers = #tpu.dot_dimension_numbers<[1], [0], [0], [1], [0, 0, 1, 1], [], []>} : vector<64x80xbf16>, vector<80x128xbf16>, vector<64x128xf32> -> vector<64x128xf32>
    %54 = arith.addf %48, %53 : vector<64x128xf32>
    %c0_72 = arith.constant 0 : index
    %c0_73 = arith.constant 0 : index
    %c32_74 = arith.constant 32 : index
    %c0_75 = arith.constant 0 : index
    %55 = vector.load %arg3[%c0_72, %c0_73, %c32_74, %c0_75] : memref<1x1x96x80xbf16, #tpu.memory_space<vmem>>, vector<1x1x64x80xbf16>
    %56 = vector.shape_cast %55 : vector<1x1x64x80xbf16> to vector<64x80xbf16>
    %c1_76 = arith.constant 1 : index
    %c4_77 = arith.constant 4 : index
    %c0_78 = arith.constant 0 : index
    %c0_79 = arith.constant 0 : index
    %57 = vector.load %arg7[%c1_76, %c4_77, %c0_78, %c0_79] : memref<5x5x80x128xbf16, #tpu.memory_space<vmem>>, vector<1x1x80x128xbf16>
    %58 = vector.shape_cast %57 : vector<1x1x80x128xbf16> to vector<80x128xbf16>
    %cst_80 = arith.constant dense<0.000000e+00> : vector<64x128xf32>
    %59 = tpu.matmul %56, %58, %cst_80 {dimension_numbers = #tpu.dot_dimension_numbers<[1], [0], [0], [1], [0, 0, 1, 1], [], []>} : vector<64x80xbf16>, vector<80x128xbf16>, vector<64x128xf32> -> vector<64x128xf32>
    %60 = arith.addf %54, %59 : vector<64x128xf32>
    %c0_81 = arith.constant 0 : index
    %c0_82 = arith.constant 0 : index
    %c0_83 = arith.constant 0 : index
    %c0_84 = arith.constant 0 : index
    %61 = vector.load %arg4[%c0_81, %c0_82, %c0_83, %c0_84] : memref<1x1x96x80xbf16, #tpu.memory_space<vmem>>, vector<1x1x64x80xbf16>
    %62 = vector.shape_cast %61 : vector<1x1x64x80xbf16> to vector<64x80xbf16>
    %c2_85 = arith.constant 2 : index
    %c0_86 = arith.constant 0 : index
    %c0_87 = arith.constant 0 : index
    %c0_88 = arith.constant 0 : index
    %63 = vector.load %arg7[%c2_85, %c0_86, %c0_87, %c0_88] : memref<5x5x80x128xbf16, #tpu.memory_space<vmem>>, vector<1x1x80x128xbf16>
    %64 = vector.shape_cast %63 : vector<1x1x80x128xbf16> to vector<80x128xbf16>
    %cst_89 = arith.constant dense<0.000000e+00> : vector<64x128xf32>
    %65 = tpu.matmul %62, %64, %cst_89 {dimension_numbers = #tpu.dot_dimension_numbers<[1], [0], [0], [1], [0, 0, 1, 1], [], []>} : vector<64x80xbf16>, vector<80x128xbf16>, vector<64x128xf32> -> vector<64x128xf32>
    %66 = arith.addf %60, %65 : vector<64x128xf32>
    %c0_90 = arith.constant 0 : index
    %c0_91 = arith.constant 0 : index
    %c8_92 = arith.constant 8 : index
    %c0_93 = arith.constant 0 : index
    %67 = vector.load %arg4[%c0_90, %c0_91, %c8_92, %c0_93] : memref<1x1x96x80xbf16, #tpu.memory_space<vmem>>, vector<1x1x64x80xbf16>
    %68 = vector.shape_cast %67 : vector<1x1x64x80xbf16> to vector<64x80xbf16>
    %c2_94 = arith.constant 2 : index
    %c1_95 = arith.constant 1 : index
    %c0_96 = arith.constant 0 : index
    %c0_97 = arith.constant 0 : index
    %69 = vector.load %arg7[%c2_94, %c1_95, %c0_96, %c0_97] : memref<5x5x80x128xbf16, #tpu.memory_space<vmem>>, vector<1x1x80x128xbf16>
    %70 = vector.shape_cast %69 : vector<1x1x80x128xbf16> to vector<80x128xbf16>
    %cst_98 = arith.constant dense<0.000000e+00> : vector<64x128xf32>
    %71 = tpu.matmul %68, %70, %cst_98 {dimension_numbers = #tpu.dot_dimension_numbers<[1], [0], [0], [1], [0, 0, 1, 1], [], []>} : vector<64x80xbf16>, vector<80x128xbf16>, vector<64x128xf32> -> vector<64x128xf32>
    %72 = arith.addf %66, %71 : vector<64x128xf32>
    %c0_99 = arith.constant 0 : index
    %c0_100 = arith.constant 0 : index
    %c16_101 = arith.constant 16 : index
    %c0_102 = arith.constant 0 : index
    %73 = vector.load %arg4[%c0_99, %c0_100, %c16_101, %c0_102] : memref<1x1x96x80xbf16, #tpu.memory_space<vmem>>, vector<1x1x64x80xbf16>
    %74 = vector.shape_cast %73 : vector<1x1x64x80xbf16> to vector<64x80xbf16>
    %c2_103 = arith.constant 2 : index
    %c2_104 = arith.constant 2 : index
    %c0_105 = arith.constant 0 : index
    %c0_106 = arith.constant 0 : index
    %75 = vector.load %arg7[%c2_103, %c2_104, %c0_105, %c0_106] : memref<5x5x80x128xbf16, #tpu.memory_space<vmem>>, vector<1x1x80x128xbf16>
    %76 = vector.shape_cast %75 : vector<1x1x80x128xbf16> to vector<80x128xbf16>
    %cst_107 = arith.constant dense<0.000000e+00> : vector<64x128xf32>
    %77 = tpu.matmul %74, %76, %cst_107 {dimension_numbers = #tpu.dot_dimension_numbers<[1], [0], [0], [1], [0, 0, 1, 1], [], []>} : vector<64x80xbf16>, vector<80x128xbf16>, vector<64x128xf32> -> vector<64x128xf32>
    %78 = arith.addf %72, %77 : vector<64x128xf32>
    %c0_108 = arith.constant 0 : index
    %c0_109 = arith.constant 0 : index
    %c24_110 = arith.constant 24 : index
    %c0_111 = arith.constant 0 : index
    %79 = vector.load %arg4[%c0_108, %c0_109, %c24_110, %c0_111] : memref<1x1x96x80xbf16, #tpu.memory_space<vmem>>, vector<1x1x64x80xbf16>
    %80 = vector.shape_cast %79 : vector<1x1x64x80xbf16> to vector<64x80xbf16>
    %c2_112 = arith.constant 2 : index
    %c3_113 = arith.constant 3 : index
    %c0_114 = arith.constant 0 : index
    %c0_115 = arith.constant 0 : index
    %81 = vector.load %arg7[%c2_112, %c3_113, %c0_114, %c0_115] : memref<5x5x80x128xbf16, #tpu.memory_space<vmem>>, vector<1x1x80x128xbf16>
    %82 = vector.shape_cast %81 : vector<1x1x80x128xbf16> to vector<80x128xbf16>
    %cst_116 = arith.constant dense<0.000000e+00> : vector<64x128xf32>
    %83 = tpu.matmul %80, %82, %cst_116 {dimension_numbers = #tpu.dot_dimension_numbers<[1], [0], [0], [1], [0, 0, 1, 1], [], []>} : vector<64x80xbf16>, vector<80x128xbf16>, vector<64x128xf32> -> vector<64x128xf32>
    %84 = arith.addf %78, %83 : vector<64x128xf32>
    %c0_117 = arith.constant 0 : index
    %c0_118 = arith.constant 0 : index
    %c32_119 = arith.constant 32 : index
    %c0_120 = arith.constant 0 : index
    %85 = vector.load %arg4[%c0_117, %c0_118, %c32_119, %c0_120] : memref<1x1x96x80xbf16, #tpu.memory_space<vmem>>, vector<1x1x64x80xbf16>
    %86 = vector.shape_cast %85 : vector<1x1x64x80xbf16> to vector<64x80xbf16>
    %c2_121 = arith.constant 2 : index
    %c4_122 = arith.constant 4 : index
    %c0_123 = arith.constant 0 : index
    %c0_124 = arith.constant 0 : index
    %87 = vector.load %arg7[%c2_121, %c4_122, %c0_123, %c0_124] : memref<5x5x80x128xbf16, #tpu.memory_space<vmem>>, vector<1x1x80x128xbf16>
    %88 = vector.shape_cast %87 : vector<1x1x80x128xbf16> to vector<80x128xbf16>
    %cst_125 = arith.constant dense<0.000000e+00> : vector<64x128xf32>
    %89 = tpu.matmul %86, %88, %cst_125 {dimension_numbers = #tpu.dot_dimension_numbers<[1], [0], [0], [1], [0, 0, 1, 1], [], []>} : vector<64x80xbf16>, vector<80x128xbf16>, vector<64x128xf32> -> vector<64x128xf32>
    %90 = arith.addf %84, %89 : vector<64x128xf32>
    %c0_126 = arith.constant 0 : index
    %c0_127 = arith.constant 0 : index
    %c0_128 = arith.constant 0 : index
    %c0_129 = arith.constant 0 : index
    %91 = vector.load %arg5[%c0_126, %c0_127, %c0_128, %c0_129] : memref<1x1x96x80xbf16, #tpu.memory_space<vmem>>, vector<1x1x64x80xbf16>
    %92 = vector.shape_cast %91 : vector<1x1x64x80xbf16> to vector<64x80xbf16>
    %c3_130 = arith.constant 3 : index
    %c0_131 = arith.constant 0 : index
    %c0_132 = arith.constant 0 : index
    %c0_133 = arith.constant 0 : index
    %93 = vector.load %arg7[%c3_130, %c0_131, %c0_132, %c0_133] : memref<5x5x80x128xbf16, #tpu.memory_space<vmem>>, vector<1x1x80x128xbf16>
    %94 = vector.shape_cast %93 : vector<1x1x80x128xbf16> to vector<80x128xbf16>
    %cst_134 = arith.constant dense<0.000000e+00> : vector<64x128xf32>
    %95 = tpu.matmul %92, %94, %cst_134 {dimension_numbers = #tpu.dot_dimension_numbers<[1], [0], [0], [1], [0, 0, 1, 1], [], []>} : vector<64x80xbf16>, vector<80x128xbf16>, vector<64x128xf32> -> vector<64x128xf32>
    %96 = arith.addf %90, %95 : vector<64x128xf32>
    %c0_135 = arith.constant 0 : index
    %c0_136 = arith.constant 0 : index
    %c8_137 = arith.constant 8 : index
    %c0_138 = arith.constant 0 : index
    %97 = vector.load %arg5[%c0_135, %c0_136, %c8_137, %c0_138] : memref<1x1x96x80xbf16, #tpu.memory_space<vmem>>, vector<1x1x64x80xbf16>
    %98 = vector.shape_cast %97 : vector<1x1x64x80xbf16> to vector<64x80xbf16>
    %c3_139 = arith.constant 3 : index
    %c1_140 = arith.constant 1 : index
    %c0_141 = arith.constant 0 : index
    %c0_142 = arith.constant 0 : index
    %99 = vector.load %arg7[%c3_139, %c1_140, %c0_141, %c0_142] : memref<5x5x80x128xbf16, #tpu.memory_space<vmem>>, vector<1x1x80x128xbf16>
    %100 = vector.shape_cast %99 : vector<1x1x80x128xbf16> to vector<80x128xbf16>
    %cst_143 = arith.constant dense<0.000000e+00> : vector<64x128xf32>
    %101 = tpu.matmul %98, %100, %cst_143 {dimension_numbers = #tpu.dot_dimension_numbers<[1], [0], [0], [1], [0, 0, 1, 1], [], []>} : vector<64x80xbf16>, vector<80x128xbf16>, vector<64x128xf32> -> vector<64x128xf32>
    %102 = arith.addf %96, %101 : vector<64x128xf32>
    %c0_144 = arith.constant 0 : index
    %c0_145 = arith.constant 0 : index
    %c16_146 = arith.constant 16 : index
    %c0_147 = arith.constant 0 : index
    %103 = vector.load %arg5[%c0_144, %c0_145, %c16_146, %c0_147] : memref<1x1x96x80xbf16, #tpu.memory_space<vmem>>, vector<1x1x64x80xbf16>
    %104 = vector.shape_cast %103 : vector<1x1x64x80xbf16> to vector<64x80xbf16>
    %c3_148 = arith.constant 3 : index
    %c2_149 = arith.constant 2 : index
    %c0_150 = arith.constant 0 : index
    %c0_151 = arith.constant 0 : index
    %105 = vector.load %arg7[%c3_148, %c2_149, %c0_150, %c0_151] : memref<5x5x80x128xbf16, #tpu.memory_space<vmem>>, vector<1x1x80x128xbf16>
    %106 = vector.shape_cast %105 : vector<1x1x80x128xbf16> to vector<80x128xbf16>
    %cst_152 = arith.constant dense<0.000000e+00> : vector<64x128xf32>
    %107 = tpu.matmul %104, %106, %cst_152 {dimension_numbers = #tpu.dot_dimension_numbers<[1], [0], [0], [1], [0, 0, 1, 1], [], []>} : vector<64x80xbf16>, vector<80x128xbf16>, vector<64x128xf32> -> vector<64x128xf32>
    %108 = arith.addf %102, %107 : vector<64x128xf32>
    %c0_153 = arith.constant 0 : index
    %c0_154 = arith.constant 0 : index
    %c24_155 = arith.constant 24 : index
    %c0_156 = arith.constant 0 : index
    %109 = vector.load %arg5[%c0_153, %c0_154, %c24_155, %c0_156] : memref<1x1x96x80xbf16, #tpu.memory_space<vmem>>, vector<1x1x64x80xbf16>
    %110 = vector.shape_cast %109 : vector<1x1x64x80xbf16> to vector<64x80xbf16>
    %c3_157 = arith.constant 3 : index
    %c3_158 = arith.constant 3 : index
    %c0_159 = arith.constant 0 : index
    %c0_160 = arith.constant 0 : index
    %111 = vector.load %arg7[%c3_157, %c3_158, %c0_159, %c0_160] : memref<5x5x80x128xbf16, #tpu.memory_space<vmem>>, vector<1x1x80x128xbf16>
    %112 = vector.shape_cast %111 : vector<1x1x80x128xbf16> to vector<80x128xbf16>
    %cst_161 = arith.constant dense<0.000000e+00> : vector<64x128xf32>
    %113 = tpu.matmul %110, %112, %cst_161 {dimension_numbers = #tpu.dot_dimension_numbers<[1], [0], [0], [1], [0, 0, 1, 1], [], []>} : vector<64x80xbf16>, vector<80x128xbf16>, vector<64x128xf32> -> vector<64x128xf32>
    %114 = arith.addf %108, %113 : vector<64x128xf32>
    %c0_162 = arith.constant 0 : index
    %c0_163 = arith.constant 0 : index
    %c32_164 = arith.constant 32 : index
    %c0_165 = arith.constant 0 : index
    %115 = vector.load %arg5[%c0_162, %c0_163, %c32_164, %c0_165] : memref<1x1x96x80xbf16, #tpu.memory_space<vmem>>, vector<1x1x64x80xbf16>
    %116 = vector.shape_cast %115 : vector<1x1x64x80xbf16> to vector<64x80xbf16>
    %c3_166 = arith.constant 3 : index
    %c4_167 = arith.constant 4 : index
    %c0_168 = arith.constant 0 : index
    %c0_169 = arith.constant 0 : index
    %117 = vector.load %arg7[%c3_166, %c4_167, %c0_168, %c0_169] : memref<5x5x80x128xbf16, #tpu.memory_space<vmem>>, vector<1x1x80x128xbf16>
    %118 = vector.shape_cast %117 : vector<1x1x80x128xbf16> to vector<80x128xbf16>
    %cst_170 = arith.constant dense<0.000000e+00> : vector<64x128xf32>
    %119 = tpu.matmul %116, %118, %cst_170 {dimension_numbers = #tpu.dot_dimension_numbers<[1], [0], [0], [1], [0, 0, 1, 1], [], []>} : vector<64x80xbf16>, vector<80x128xbf16>, vector<64x128xf32> -> vector<64x128xf32>
    %120 = arith.addf %114, %119 : vector<64x128xf32>
    %c0_171 = arith.constant 0 : index
    %c0_172 = arith.constant 0 : index
    %c0_173 = arith.constant 0 : index
    %c0_174 = arith.constant 0 : index
    %121 = vector.load %arg6[%c0_171, %c0_172, %c0_173, %c0_174] : memref<1x1x96x80xbf16, #tpu.memory_space<vmem>>, vector<1x1x64x80xbf16>
    %122 = vector.shape_cast %121 : vector<1x1x64x80xbf16> to vector<64x80xbf16>
    %c4_175 = arith.constant 4 : index
    %c0_176 = arith.constant 0 : index
    %c0_177 = arith.constant 0 : index
    %c0_178 = arith.constant 0 : index
    %123 = vector.load %arg7[%c4_175, %c0_176, %c0_177, %c0_178] : memref<5x5x80x128xbf16, #tpu.memory_space<vmem>>, vector<1x1x80x128xbf16>
    %124 = vector.shape_cast %123 : vector<1x1x80x128xbf16> to vector<80x128xbf16>
    %cst_179 = arith.constant dense<0.000000e+00> : vector<64x128xf32>
    %125 = tpu.matmul %122, %124, %cst_179 {dimension_numbers = #tpu.dot_dimension_numbers<[1], [0], [0], [1], [0, 0, 1, 1], [], []>} : vector<64x80xbf16>, vector<80x128xbf16>, vector<64x128xf32> -> vector<64x128xf32>
    %126 = arith.addf %120, %125 : vector<64x128xf32>
    %c0_180 = arith.constant 0 : index
    %c0_181 = arith.constant 0 : index
    %c8_182 = arith.constant 8 : index
    %c0_183 = arith.constant 0 : index
    %127 = vector.load %arg6[%c0_180, %c0_181, %c8_182, %c0_183] : memref<1x1x96x80xbf16, #tpu.memory_space<vmem>>, vector<1x1x64x80xbf16>
    %128 = vector.shape_cast %127 : vector<1x1x64x80xbf16> to vector<64x80xbf16>
    %c4_184 = arith.constant 4 : index
    %c1_185 = arith.constant 1 : index
    %c0_186 = arith.constant 0 : index
    %c0_187 = arith.constant 0 : index
    %129 = vector.load %arg7[%c4_184, %c1_185, %c0_186, %c0_187] : memref<5x5x80x128xbf16, #tpu.memory_space<vmem>>, vector<1x1x80x128xbf16>
    %130 = vector.shape_cast %129 : vector<1x1x80x128xbf16> to vector<80x128xbf16>
    %cst_188 = arith.constant dense<0.000000e+00> : vector<64x128xf32>
    %131 = tpu.matmul %128, %130, %cst_188 {dimension_numbers = #tpu.dot_dimension_numbers<[1], [0], [0], [1], [0, 0, 1, 1], [], []>} : vector<64x80xbf16>, vector<80x128xbf16>, vector<64x128xf32> -> vector<64x128xf32>
    %132 = arith.addf %126, %131 : vector<64x128xf32>
    %c0_189 = arith.constant 0 : index
    %c0_190 = arith.constant 0 : index
    %c16_191 = arith.constant 16 : index
    %c0_192 = arith.constant 0 : index
    %133 = vector.load %arg6[%c0_189, %c0_190, %c16_191, %c0_192] : memref<1x1x96x80xbf16, #tpu.memory_space<vmem>>, vector<1x1x64x80xbf16>
    %134 = vector.shape_cast %133 : vector<1x1x64x80xbf16> to vector<64x80xbf16>
    %c4_193 = arith.constant 4 : index
    %c2_194 = arith.constant 2 : index
    %c0_195 = arith.constant 0 : index
    %c0_196 = arith.constant 0 : index
    %135 = vector.load %arg7[%c4_193, %c2_194, %c0_195, %c0_196] : memref<5x5x80x128xbf16, #tpu.memory_space<vmem>>, vector<1x1x80x128xbf16>
    %136 = vector.shape_cast %135 : vector<1x1x80x128xbf16> to vector<80x128xbf16>
    %cst_197 = arith.constant dense<0.000000e+00> : vector<64x128xf32>
    %137 = tpu.matmul %134, %136, %cst_197 {dimension_numbers = #tpu.dot_dimension_numbers<[1], [0], [0], [1], [0, 0, 1, 1], [], []>} : vector<64x80xbf16>, vector<80x128xbf16>, vector<64x128xf32> -> vector<64x128xf32>
    %138 = arith.addf %132, %137 : vector<64x128xf32>
    %c0_198 = arith.constant 0 : index
    %c0_199 = arith.constant 0 : index
    %c24_200 = arith.constant 24 : index
    %c0_201 = arith.constant 0 : index
    %139 = vector.load %arg6[%c0_198, %c0_199, %c24_200, %c0_201] : memref<1x1x96x80xbf16, #tpu.memory_space<vmem>>, vector<1x1x64x80xbf16>
    %140 = vector.shape_cast %139 : vector<1x1x64x80xbf16> to vector<64x80xbf16>
    %c4_202 = arith.constant 4 : index
    %c3_203 = arith.constant 3 : index
    %c0_204 = arith.constant 0 : index
    %c0_205 = arith.constant 0 : index
    %141 = vector.load %arg7[%c4_202, %c3_203, %c0_204, %c0_205] : memref<5x5x80x128xbf16, #tpu.memory_space<vmem>>, vector<1x1x80x128xbf16>
    %142 = vector.shape_cast %141 : vector<1x1x80x128xbf16> to vector<80x128xbf16>
    %cst_206 = arith.constant dense<0.000000e+00> : vector<64x128xf32>
    %143 = tpu.matmul %140, %142, %cst_206 {dimension_numbers = #tpu.dot_dimension_numbers<[1], [0], [0], [1], [0, 0, 1, 1], [], []>} : vector<64x80xbf16>, vector<80x128xbf16>, vector<64x128xf32> -> vector<64x128xf32>
    %144 = arith.addf %138, %143 : vector<64x128xf32>
    %c0_207 = arith.constant 0 : index
    %c0_208 = arith.constant 0 : index
    %c32_209 = arith.constant 32 : index
    %c0_210 = arith.constant 0 : index
    %145 = vector.load %arg6[%c0_207, %c0_208, %c32_209, %c0_210] : memref<1x1x96x80xbf16, #tpu.memory_space<vmem>>, vector<1x1x64x80xbf16>
    %146 = vector.shape_cast %145 : vector<1x1x64x80xbf16> to vector<64x80xbf16>
    %c4_211 = arith.constant 4 : index
    %c4_212 = arith.constant 4 : index
    %c0_213 = arith.constant 0 : index
    %c0_214 = arith.constant 0 : index
    %147 = vector.load %arg7[%c4_211, %c4_212, %c0_213, %c0_214] : memref<5x5x80x128xbf16, #tpu.memory_space<vmem>>, vector<1x1x80x128xbf16>
    %148 = vector.shape_cast %147 : vector<1x1x80x128xbf16> to vector<80x128xbf16>
    %cst_215 = arith.constant dense<0.000000e+00> : vector<64x128xf32>
    %149 = tpu.matmul %146, %148, %cst_215 {dimension_numbers = #tpu.dot_dimension_numbers<[1], [0], [0], [1], [0, 0, 1, 1], [], []>} : vector<64x80xbf16>, vector<80x128xbf16>, vector<64x128xf32> -> vector<64x128xf32>
    %150 = arith.addf %144, %149 : vector<64x128xf32>
    %c0_216 = arith.constant 0 : index
    %c0_217 = arith.constant 0 : index
    %151 = vector.load %arg8[%c0_216, %c0_217] : memref<1x128xf32, #tpu.memory_space<vmem>>, vector<1x128xf32>
    %152 = vector.broadcast %151 : vector<1x128xf32> to vector<64x128xf32>
    %153 = arith.addf %150, %152 : vector<64x128xf32>
    %c0_218 = arith.constant 0 : index
    %c0_219 = arith.constant 0 : index
    %c0_220 = arith.constant 0 : index
    %c0_221 = arith.constant 0 : index
    %154 = vector.load %arg9[%c0_218, %c0_219, %c0_220, %c0_221] : memref<1x1x64x128xf32, #tpu.memory_space<vmem>>, vector<1x1x64x128xf32>
    %155 = vector.shape_cast %154 : vector<1x1x64x128xf32> to vector<64x128xf32>
    %156 = vector.shape_cast %153 : vector<64x128xf32> to vector<1x1x64x128xf32>
    tpu.vector_store %arg9[%c0_218, %c0_219, %c0_220, %c0_221], %156 {strides = array<i32>} : memref<1x1x64x128xf32, #tpu.memory_space<vmem>>, vector<1x1x64x128xf32>,
    return
  }
  func.func @transform_0(%arg0: i32, %arg1: i32) -> (i32, i32, i32, i32) {
    %c0_i32 = arith.constant 0 : i32
    %0 = arith.addi %arg1, %c0_i32 : i32
    %c0_i32_0 = arith.constant 0 : i32
    %c0_i32_1 = arith.constant 0 : i32
    %c0_i32_2 = arith.constant 0 : i32
    return %arg0, %0, %c0_i32_0, %c0_i32_1 : i32, i32, i32, i32
  }
  func.func @transform_1(%arg0: i32, %arg1: i32) -> (i32, i32, i32, i32) {
    %c1_i32 = arith.constant 1 : i32
    %0 = arith.addi %arg1, %c1_i32 : i32
    %c0_i32 = arith.constant 0 : i32
    %c0_i32_0 = arith.constant 0 : i32
    %c0_i32_1 = arith.constant 0 : i32
    return %arg0, %0, %c0_i32, %c0_i32_0 : i32, i32, i32, i32
  }
  func.func @transform_2(%arg0: i32, %arg1: i32) -> (i32, i32, i32, i32) {
    %c2_i32 = arith.constant 2 : i32
    %0 = arith.addi %arg1, %c2_i32 : i32
    %c0_i32 = arith.constant 0 : i32
    %c0_i32_0 = arith.constant 0 : i32
    %c0_i32_1 = arith.constant 0 : i32
    return %arg0, %0, %c0_i32, %c0_i32_0 : i32, i32, i32, i32
  }
  func.func @transform_3(%arg0: i32, %arg1: i32) -> (i32, i32, i32, i32) {
    %c3_i32 = arith.constant 3 : i32
    %0 = arith.addi %arg1, %c3_i32 : i32
    %c0_i32 = arith.constant 0 : i32
    %c0_i32_0 = arith.constant 0 : i32
    %c0_i32_1 = arith.constant 0 : i32
    return %arg0, %0, %c0_i32, %c0_i32_0 : i32, i32, i32, i32
  }
  func.func @transform_4(%arg0: i32, %arg1: i32) -> (i32, i32, i32, i32) {
    %c4_i32 = arith.constant 4 : i32
    %0 = arith.addi %arg1, %c4_i32 : i32
    %c0_i32 = arith.constant 0 : i32
    %c0_i32_0 = arith.constant 0 : i32
    %c0_i32_1 = arith.constant 0 : i32
    return %arg0, %0, %c0_i32, %c0_i32_0 : i32, i32, i32, i32
  }
  func.func @transform_5(%arg0: i32, %arg1: i32) -> (i32, i32, i32, i32) {
    %c0_i32 = arith.constant 0 : i32
    %c0_i32_0 = arith.constant 0 : i32
    %c0_i32_1 = arith.constant 0 : i32
    %c0_i32_2 = arith.constant 0 : i32
    %c0_i32_3 = arith.constant 0 : i32
    return %c0_i32, %c0_i32_0, %c0_i32_1, %c0_i32_2 : i32, i32, i32, i32
  }
  func.func @transform_6(%arg0: i32, %arg1: i32) -> (i32, i32) {
    %c0_i32 = arith.constant 0 : i32
    %c0_i32_0 = arith.constant 0 : i32
    %c0_i32_1 = arith.constant 0 : i32
    return %c0_i32, %c0_i32_0 : i32, i32
  }
  func.func @transform_7(%arg0: i32, %arg1: i32) -> (i32, i32, i32, i32) {
    %c0_i32 = arith.constant 0 : i32
    %c0_i32_0 = arith.constant 0 : i32
    %c0_i32_1 = arith.constant 0 : i32
    return %arg0, %arg1, %c0_i32, %c0_i32_0 : i32, i32, i32, i32
  }
}

</mosaic_0001>

<bundles_post_ra>
// kernel: dilated_conv_block_forward.1
= control target key start
LH: loop header
LB: loop body
LE: loop exit
PB: predicated region body
PF: predicated region fallthrough
CT: control target
= control target key end

     0   :  { %s6304_s24 = smov 0   ;;  %s6306_s25 = smov 0   ;;  %s7005_s0 = inlined_call_operand.vmem [shape: bf16[2,12,96,80], index: 0, kind: input, shape index: {}, may-alias: {0,1,2,3,4}]   ;;  %s7006_s1 = inlined_call_operand.vmem [shape: bf16[2,12,96,80], index: 1, kind: input, shape index: {}, may-alias: {0,1,2,3,4}]   ;;  %s7007_s2 = inlined_call_operand.vmem [shape: bf16[2,12,96,80], index: 2, kind: input, shape index: {}, may-alias: {0,1,2,3,4}]   ;;  %s7008_s3 = inlined_call_operand.vmem [shape: bf16[2,12,96,80], index: 3, kind: input, shape index: {}, may-alias: {0,1,2,3,4}]   ;;  %s7009_s4 = inlined_call_operand.vmem [shape: bf16[2,12,96,80], index: 4, kind: input, shape index: {}, may-alias: {0,1,2,3,4}]   ;;  %s7010_s5 = inlined_call_operand.vmem [shape: bf16[5,5,80,128], index: 5, kind: input, shape index: {}]   ;;  %s7011_s6 = inlined_call_operand.vmem [shape: f32[1,128], index: 6, kind: input, shape index: {}]   ;;  %s7012_s7 = inlined_call_operand.vmem [shape: f32[2,8,64,128], index: 7, kind: output, shape index: {}]  }
   0x1   :  { %s6308_s26 = smov 0   ;;  %s6310_s27 = smov 0  }
   0x2   :  { %s6312_s28 = smov 0  }
   0x3 LB: > { %s26_s29 = sadd.s32 1, %s6254_s26  ;;  %s29_s30 = sadd.s32 1, %s6258_s27  ;;  %s6262_s28 = sphi %s6312_s28, %s17_s28   ;;  %s6258_s27 = sphi %s6310_s27, %s7016_s27   ;;  %s6254_s26 = sphi %s6308_s26, %s7015_s26   ;;  %s6250_s25 = sphi %s6306_s25, %s7014_s25   ;;  %s6246_s24 = sphi %s6304_s24, %s7013_s24  }
   0x4   : > { %p27_p0 = scmp.ge.s32.totalorder %s26_s29, 8  ;;  %p4499_p1 = scmp.ge.s32.totalorder %s6262_s28, 1 }
   0x5   : > { %p337_p2 = scmp.lt.s32.totalorder %s6262_s28, 17 }
   0x6   : > { %s7018_s29 = smov (%p27_p0, %s26_s29), 0  ;;  %s7020_s30 = smov (!%p27_p0, %s29_s30), %s6258_s27 }
   0x7   : > { %p338_p3 = pnand %p4499_p1, %p337_p2  ;;  %p31_p4 = scmp.ge.s32.totalorder %s7020_s30, 2 }
   0x8   : > { %v5999_v0 = vld [vmem:[%s7010_s5 + $0x28] sm:$0xff] (!%p338_p3)   ;;  %p417_p5 = scmp.lt.s32.totalorder (!%p338_p3), %s6250_s25, 1  ;;  %v6000_v1 = vld [vmem:[%s7010_s5 + $0x1e0] sm:$0xff] (!%p338_p3)   ;;  %p419_p6 = scmp.lt.s32.totalorder (!%p338_p3), %s6246_s24, 11  ;;  %v6001_v2 = vld [vmem:[%s7010_s5 + $0x30] sm:$0xff] (!%p338_p3)   ;;  %vm560_vm0 = vcmask (!%p338_p3), 654336  }
   0x9   : > { %s7022_s30 = smov (%p31_p4, %s7020_s30), 0  ;;  %341 = sbr.rel (%p338_p3) target bundleno = 491 (0x1eb), region = 48 }
   0xa   : > { %5301 = vmatprep.subr.bf16.mxu1 (!%p338_p3), %v5999_v0  ;;  %5517 = vmatprep.subr.bf16.mxu0 (!%p338_p3), %v6000_v1  ;;  %v6002_v3 = vld [vmem:[%s7010_s5 + $0x1e8] sm:$0xff] (!%p338_p3)   ;;  %v6003_v4 = vld [vmem:[%s7010_s5 + $0x38] sm:$0xff] (!%p338_p3)   ;;  %v6004_v5 = vld [vmem:[%s7010_s5 + $0x1f0] sm:$0xff] (!%p338_p3)   ;;  %s448_s9 = sadd.s32 (!%p338_p3), 3, %s6246_s24  ;;  %p472_p11 = scmp.lt.s32.totalorder (!%p338_p3), %s6246_s24, 7 }
   0xb   : > { %5302 = vmatpush3.bf16.msra.mxu1 (!%p338_p3), %v5999_v0  ;;  %5518 = vmatpush3.bf16.msra.mxu0 (!%p338_p3), %v6000_v1  ;;  %v6005_v6 = vld [vmem:[%s7010_s5 + $0x40] sm:$0xff] (!%p338_p3)   ;;  %v6006_v7 = vld [vmem:[%s7010_s5 + $0x1f8] sm:$0xff] (!%p338_p3)   ;;  %v6007_v10 = vld [vmem:[%s7010_s5 + $0x48] sm:$0xff] (!%p338_p3)   ;;  %p451_p8 = scmp.lt.s32.totalorder (!%p338_p3), %s448_s9, 11 }
   0xc   : > { %5303 = vmatprep.subr.bf16.mxu1 (!%p338_p3), %v6001_v2  ;;  %5519 = vmatprep.subr.bf16.mxu0 (!%p338_p3), %v6002_v3  ;;  %v6008_v12 = vld [vmem:[%s7010_s5 + $0x200] sm:$0xff] (!%p338_p3)   ;;  %v6015_v16 = vld [vmem:[%s7010_s5 + $0x208] sm:$0xff] (!%p338_p3)   ;;  %v6018_v20 = vld [vmem:[%s7010_s5 + $0x210] sm:$0xff] (!%p338_p3)  }
   0xd   : > { %v6013_v15 = vld [vmem:[%s7010_s5] sm:$0xff] (!%p338_p3)   ;;  %v6017_v18 = vld [vmem:[%s7010_s5 + $0x8] sm:$0xff] (!%p338_p3)   ;;  %v6019_v26 = vld [vmem:[%s7010_s5 + $0x10] sm:$0xff] (!%p338_p3)  }
   0xe   : > { %v6020_v29 = vld [vmem:[%s7010_s5 + $0x218] sm:$0xff] (!%p338_p3)   ;;  %v6024_v35 = vld [vmem:[%s7010_s5 + $0x220] sm:$0xff] (!%p338_p3)   ;;  %v6028_v38 = vld [vmem:[%s7010_s5 + $0x228] sm:$0xff] (!%p338_p3)  }
   0xf   : > { %5304 = vmatpush3.bf16.msra.mxu1 (!%p338_p3), %v6001_v2  ;;  %5520 = vmatpush3.bf16.msra.mxu0 (!%p338_p3), %v6002_v3  ;;  %v6022_v33 = vld [vmem:[%s7010_s5 + $0x18] sm:$0xff] (!%p338_p3)   ;;  %v6027_v37 = vld [vmem:[%s7010_s5 + $0x20] sm:$0xff] (!%p338_p3)   ;;  %v6029_v39 = vld [vmem:[%s7010_s5 + $0x50] sm:$0xff] (!%p338_p3)  }
  0x10   : > { %s7024_s25 = smov (!%p417_p5, %s6250_s25), 1  ;;  %5305 = vmatprep.subr.bf16.mxu1 %v6003_v4  ;;  %5521 = vmatprep.subr.bf16.mxu0 %v6004_v5  ;;  %v6031_v40 = vld [vmem:[%s7010_s5 + $0x230] sm:$0xff]   ;;  %v6033_v43 = vld [vmem:[%s7010_s5 + $0x58] sm:$0xff]   ;;  %v6035_v47 = vld [vmem:[%s7010_s5 + $0x60] sm:$0xff]   ;;  %s7028_s9 = smov (!%p451_p8, %s448_s9), 11 }
  0x11   : > { %s420_s16 = scalar_select %p419_p6, %s6246_s24, 11  ;;  %v6034_v44 = vld [vmem:[%s7010_s5 + $0x238] sm:$0xff]   ;;  %v6036_v48 = vld [vmem:[%s7010_s5 + $0x240] sm:$0xff]   ;;  %v6038_v49 = vld [vmem:[%s7010_s5 + $0x68] sm:$0xff]  }
  0x12   : > { %s6356_s19 = smul.u32 144, %s7024_s25  ;;  %v6040_v52 = vld [vmem:[%s7010_s5 + $0x248] sm:$0xff]   ;;  %v6043_v55 = vld [vmem:[%s7010_s5 + $0x70] sm:$0xff]   ;;  %v6046_v57 = vld [vmem:[%s7010_s5 + $0x78] sm:$0xff]  }
  0x13   : > { %s5953_s22 = smul.u32 12, %s420_s16  ;;  %s437_s16 = sadd.s32 2, %s6246_s24  ;;  %5306 = vmatpush3.bf16.msra.mxu1 %v6003_v4  ;;  %5522 = vmatpush3.bf16.msra.mxu0 %v6004_v5  ;;  %v6044_v56 = vld [vmem:[%s7010_s5 + $0x250] sm:$0xff]   ;;  %v6048_v58 = vld [vmem:[%s7010_s5 + $0x258] sm:$0xff]   ;;  %v6051_v61 = vld [vmem:[%s7010_s5 + $0x80] sm:$0xff]  }
  0x14   : > { %p440_p7 = scmp.lt.s32.totalorder %s437_s16, 11  ;;  %5307 = vmatprep.subr.bf16.mxu1 %v6005_v6  ;;  %5523 = vmatprep.subr.bf16.mxu0 %v6006_v7  ;;  %v6052_v62 = vld [vmem:[%s7010_s5 + $0x260] sm:$0xff]   ;;  %v6053_v1 = vld [vmem:[%s7010_s5 + $0x88] sm:$0xff]   ;;  %v6056_v3 = vld [vmem:[%s7010_s5 + $0x90] sm:$0xff]  }
  0x15   : > { %s423_s23 = sadd.s32 %s6356_s19, %s5953_s22  ;;  %v6054_v2 = vld [vmem:[%s7010_s5 + $0x268] sm:$0xff]  }
  0x16   : > { %s4500_s10 = sshll.u32 %s423_s23, 2  ;;  %s7026_s16 = smov (!%p440_p7, %s437_s16), 11 }
  0x17   : > { %s6371_s15 = scalar_lea.vmem %s7005_s0, %s4500_s10  ;;  %5308 = vmatpush3.bf16.msra.mxu1 %v6005_v6  ;;  %s5956_s22 = smul.u32 12, %s7026_s16  ;;  %5524 = vmatpush3.bf16.msra.mxu0 %v6006_v7  ;;  %v6058_v6 = vld [vmem:[%s7010_s5 + $0x270] sm:$0xff]  }
  0x18   : > { %v6375_v8 = vld [vmem:[%s6371_s15 + $0x4] sm:$0xf]  ;;  %v6378_v9 = vld [vmem:[%s6371_s15 + $0x8] sm:$0xf]  ;;  %v6389_v13 = vld [vmem:[%s6371_s15 + $0xc] sm:$0xf]  ;;  %5309 = vmatprep.subr.bf16.mxu1 %v6007_v10  ;;  %5525 = vmatprep.subr.bf16.mxu0 %v6008_v12 }
  0x19   : > { %v4518_v11 = vcombine.low %v6375_v8, %v6378_v9  ;;  %v6393_v14 = vld [vmem:[%s6371_s15 + $0x10] sm:$0xf]  ;;  %s444_s11 = sadd.s32 %s5956_s22, %s6356_s19  ;;  %v6408_v19 = vld [vmem:[%s6371_s15 + $0x14] sm:$0xf]  ;;  %v6419_v21 = vld [vmem:[%s6371_s15 + $0x18] sm:$0xf]  ;;  %v4532_v41 = vcombine.low %v6378_v9, %v6389_v13 }
  0x1a   : > { %s4502_s12 = sshll.u32 %s444_s11, 2  ;;  %v4519_v17 = vcombine.low %v6389_v13, %v6393_v14  ;;  %v4520_v24 = vcombine.low %v6408_v19, %v6419_v21  ;;  %v6433_v27 = vld [vmem:[%s6371_s15 + $0x1c] sm:$0xf]  ;;  %v498_v28 = vld [vmem:[%s6371_s15 + $0x20] sm:$0xf]  ;;  %v4533_v45 = vcombine.low %v6393_v14, %v6408_v19  ;;  %v6045_v53 = vld [vmem:[%s6371_s15 + $0x8] sm:$0xff]  }
  0x1b   : > { %5311 = vmatprep.mubr.msk.bf16.mxu1 %vm560_vm0, %v4518_v11  ;;  %5310 = vmatpush3.bf16.msra.mxu1 %v6007_v10  ;;  %s6413_s18 = scalar_lea.vmem %s7007_s2, %s4502_s12  ;;  %v480_v30 = vld [vmem:[%s6371_s15] sm:$0xf]  ;;  %v4521_v31 = vcombine.low %v6433_v27, %v498_v28  ;;  %v4534_v50 = vcombine.low %v6419_v21, %v6433_v27  ;;  %s5957_s10 = smul.u32 12, %s7028_s9  ;;  %v6049_v59 = vld [vmem:[%s6371_s15 + $0x10] sm:$0xff]   ;;  %v6055_v63 = vld [vmem:[%s6371_s15 + $0x18] sm:$0xff]  }
  0x1c   : > { %5526 = vmatpush3.bf16.msra.mxu0 %v6008_v12  ;;  %5319 = vmatprep.subr.bf16.mxu1 %v6013_v15  ;;  %v6014_v22 = vld [vmem:[%s6413_s18 + $0x8] sm:$0xff]   ;;  %v6016_v23 = vld [vmem:[%s6413_s18 + $0x10] sm:$0xff]   ;;  %v6023_v25 = vld [vmem:[%s6413_s18 + $0x18] sm:$0xff]   ;;  %v4531_v34 = vcombine.low %v480_v30, %v6375_v8 }
  0x1d   : > { %5535 = vmatprep.subr.bf16.mxu0 %v6015_v16  ;;  %5527 = vmatprep.mubr.msk.bf16.mxu0 %vm560_vm0, %v6014_v22  ;;  %v6026_v32 = vld [vmem:[%s6413_s18 + $0x20] sm:$0xff]   ;;  %v6030_v36 = vld [vmem:[%s6413_s18 + $0xc] sm:$0xff]   ;;  %v6032_v42 = vld [vmem:[%s6413_s18 + $0x14] sm:$0xff]   ;;  %s455_s9 = sadd.s32 %s5957_s10, %s6356_s19  ;;  %s4506_s10 = sshll.u32 %s7024_s25, 6 }
  0x1e   : > { %5312 = vmatmul.mubr.msk.bf16.vlgmr.msra.gmra.mrb[0].mxu1 %vm560_vm0, %v4519_v17  ;;  %v6039_v46 = vld [vmem:[%s6413_s18 + $0x1c] sm:$0xff]   ;;  %v6042_v51 = vld [vmem:[%s6413_s18 + $0x24] sm:$0xff]   ;;  %v6047_v54 = vld [vmem:[%s6413_s18 + $0x10] sm:$0xff]   ;;  %s4503_s22 = sshll.u32 %s455_s9, 2  ;;  %s426_s9 = sadd.s32 1, %s6246_s24 }
  0x1f   : > { %5320 = vmatpush3.bf16.msra.mxu1 %v6013_v15  ;;  %5528 = vmatmul.mubr.msk.bf16.vlgmr.msra.gmra.mrb[0].mxu0 %vm560_vm0, %v6016_v23  ;;  %v6050_v60 = vld [vmem:[%s6413_s18 + $0x18] sm:$0xff]   ;;  %s6530_s14 = scalar_lea.vmem %s7008_s3, %s4503_s22  ;;  %v6057_v0 = vld [vmem:[%s6413_s18 + $0x20] sm:$0xff]   ;;  %v6060_v5 = vld [vmem:[%s6413_s18 + $0x28] sm:$0xff]   ;;  %p429_p9 = scmp.lt.s32.totalorder %s426_s9, 11 }
  0x20   : > { %5536 = vmatpush3.bf16.msra.mxu0 %v6015_v16  ;;  %5321 = vmatprep.subr.bf16.mxu1 %v6017_v18  ;;  %v6059_v4 = vld [vmem:[%s6371_s15 + $0x20] sm:$0xff]   ;;  %v6063_v7 = vld [vmem:[%s6371_s15 + $0xc] sm:$0xff]   ;;  %v6061_v9 = vld [vmem:[%s7010_s5 + $0x98] sm:$0xff]  }
  0x21   : > { %5537 = vmatprep.subr.bf16.mxu0 %v6018_v20  ;;  %5315 = vmatprep.mubr.msk.bf16.mxu1 %vm560_vm0, %v4520_v24  ;;  %v6065_v8 = vld [vmem:[%s6530_s14] sm:$0xff]   ;;  %v6062_v10 = vld [vmem:[%s7010_s5 + $0x278] sm:$0xff]   ;;  %v6068_v14 = vld [vmem:[%s6530_s14 + $0x8] sm:$0xff]   ;;  %s7030_s9 = smov (!%p429_p9, %s426_s9), 11 }
  0x22   : > { %5531 = vmatprep.mubr.msk.bf16.mxu0 %vm560_vm0, %v6023_v25  ;;  %v6064_v11 = vld [vmem:[%s7010_s5 + $0xa0] sm:$0xff]   ;;  %v6067_v13 = vld [vmem:[%s6371_s15 + $0x14] sm:$0xff]   ;;  %v6069_v15 = vld [vmem:[%s7010_s5 + $0xa8] sm:$0xff]   ;;  %s5955_s13 = smul.u32 12, %s7030_s9  ;;  %s459_s9 = sadd.s32 4, %s6246_s24 }
  0x23   : > { %5322 = vmatpush3.bf16.msra.mxu1 %v6017_v18  ;;  %v6066_v12 = vld [vmem:[%s7010_s5 + $0x280] sm:$0xff]   ;;  %v6070_v16 = vld [vmem:[%s7010_s5 + $0x288] sm:$0xff]   ;;  %v6075_v18 = vld [vmem:[%s6530_s14 + $0x10] sm:$0xff]   ;;  %p462_p10 = scmp.lt.s32.totalorder %s459_s9, 11  ;;  %s7034_s24 = smov (!%p472_p11, %s6246_s24), 7 }
  0x24   : > { %5538 = vmatpush3.bf16.msra.mxu0 %v6018_v20  ;;  %5323 = vmatprep.subr.bf16.mxu1 %v6019_v26  ;;  %v6073_v17 = vld [vmem:[%s6371_s15 + $0x1c] sm:$0xff]   ;;  %v6071_v19 = vld [vmem:[%s7010_s5 + $0xb0] sm:$0xff]   ;;  %v6077_v22 = vld [vmem:[%s6371_s15 + $0x24] sm:$0xff]   ;;  %s433_s23 = sadd.s32 %s5955_s13, %s6356_s19 }
  0x25   : > { %5539 = vmatprep.subr.bf16.mxu0 %v6020_v29  ;;  %v6072_v20 = vld [vmem:[%s7010_s5 + $0x290] sm:$0xff]   ;;  %v6074_v21 = vld [vmem:[%s7010_s5 + $0xb8] sm:$0xff]   ;;  %s4501_s8 = sshll.u32 %s433_s23, 2  ;;  %v6079_v27 = vld [vmem:[%s7010_s5 + $0xc0] sm:$0xff]   ;;  %s7032_s9 = smov (!%p462_p10, %s459_s9), 11 }
  0x26   : > { %5316 = vmatmul.mubr.msk.bf16.gmra.mrb[4].mxu1 %vm560_vm0, %v4521_v31  ;;  %v6078_v23 = vld [vmem:[%s6530_s14 + $0x18] sm:$0xff]   ;;  %v6081_v25 = vld [vmem:[%s6371_s15 + $0x10] sm:$0xff]   ;;  %v6080_v28 = vld [vmem:[%s7010_s5 + $0x2a0] sm:$0xff]   ;;  %s6615_s20 = scalar_lea.vmem %s7006_s1, %s4501_s8  ;;  %s5958_s23 = smul.u32 12, %s7032_s9 }
  0x27   : > { %5324 = vmatpush3.bf16.msra.mxu1 %v6019_v26  ;;  %5532 = vmatmul.mubr.msk.bf16.gmra.mrb[4].mxu0 %vm560_vm0, %v6026_v32  ;;  %v6076_v24 = vld [vmem:[%s7010_s5 + $0x298] sm:$0xff]   ;;  %v6083_v26 = vld [vmem:[%s6530_s14 + $0x4] sm:$0xff]   ;;  %v6086_v32 = vld [vmem:[%s6530_s14 + $0xc] sm:$0xff]  }
  0x28   : > { %5540 = vmatpush3.bf16.msra.mxu0 %v6020_v29  ;;  %5325 = vmatprep.subr.bf16.mxu1 %v6022_v33  ;;  %v6082_v29 = vld [vmem:[%s7010_s5 + $0xc8] sm:$0xff]   ;;  %v6085_v31 = vld [vmem:[%s6371_s15 + $0x18] sm:$0xff]   ;;  %s466_s11 = sadd.s32 %s5958_s23, %s6356_s19 }
  0x29   : > { %5541 = vmatprep.subr.bf16.mxu0 %v6024_v35  ;;  %5329 = vmatprep.mubr.msk.bf16.mxu1 %vm560_vm0, %v4531_v34  ;;  %v6084_v30 = vld [vmem:[%s7010_s5 + $0x2a8] sm:$0xff]   ;;  %v6088_v34 = vld [vmem:[%s7010_s5 + $0x2b0] sm:$0xff]   ;;  %s4504_s16 = sshll.u32 %s466_s11, 2 }
  0x2a   : > { %5545 = vmatprep.mubr.msk.bf16.mxu0 %vm560_vm0, %v6030_v36  ;;  %v6093_v36 = vld [vmem:[%s6530_s14 + $0x14] sm:$0xff]   ;;  %s6751_s23 = scalar_lea.vmem %s7009_s4, %s4504_s16 }
  0x2b   : > { %5326 = vmatpush3.bf16.msra.mxu1 %v6022_v33  ;;  %v6087_v33 = vld [vmem:[%s7010_s5 + $0xd0] sm:$0xff]  }
  0x2c   : > { %5542 = vmatpush3.bf16.msra.mxu0 %v6024_v35  ;;  %5327 = vmatprep.subr.bf16.mxu1 %v6027_v37  ;;  %v6091_v35 = vld [vmem:[%s6371_s15 + $0x20] sm:$0xff]  }
  0x2d   : > { %5543 = vmatprep.subr.bf16.mxu0 %v6028_v38 }
  0x2f   : > { %5328 = vmatpush3.bf16.msra.mxu1 %v6027_v37  ;;  %v6089_v37 = vld [vmem:[%s7010_s5 + $0xd8] sm:$0xff]  }
  0x30   : > { %5544 = vmatpush3.bf16.msra.mxu0 %v6028_v38  ;;  %5337 = vmatprep.subr.bf16.mxu1 %v6029_v39  ;;  %v6090_v38 = vld [vmem:[%s7010_s5 + $0x2b8] sm:$0xff]  }
  0x31   : > { %5553 = vmatprep.subr.bf16.mxu0 %v6031_v40 }
  0x32   : > { %5330 = vmatmul.mubr.msk.bf16.vlgmr.msra.gmra.mrb[0].mxu1 %vm560_vm0, %v4532_v41  ;;  %v6096_v41 = vld [vmem:[%s6530_s14 + $0x1c] sm:$0xff]  }
  0x33   : > { %5338 = vmatpush3.bf16.msra.mxu1 %v6029_v39  ;;  %5546 = vmatmul.mubr.msk.bf16.vlgmr.msra.gmra.mrb[0].mxu0 %vm560_vm0, %v6032_v42  ;;  %v6092_v39 = vld [vmem:[%s7010_s5 + $0xe0] sm:$0xff]  }
  0x34   : > { %5554 = vmatpush3.bf16.msra.mxu0 %v6031_v40  ;;  %5339 = vmatprep.subr.bf16.mxu1 %v6033_v43  ;;  %v6095_v40 = vld [vmem:[%s6371_s15 + $0x28] sm:$0xff]   ;;  %v6094_v42 = vld [vmem:[%s7010_s5 + $0x2c0] sm:$0xff]  }
  0x35   : > { %5555 = vmatprep.subr.bf16.mxu0 %v6034_v44  ;;  %5333 = vmatprep.mubr.msk.bf16.mxu1 %vm560_vm0, %v4533_v45  ;;  %v6097_v45 = vld [vmem:[%s7010_s5 + $0xe8] sm:$0xff]  }
  0x36   : > { %5549 = vmatprep.mubr.msk.bf16.mxu0 %vm560_vm0, %v6039_v46  ;;  %v6098_v46 = vld [vmem:[%s7010_s5 + $0x2c8] sm:$0xff]  }
  0x37   : > { %5340 = vmatpush3.bf16.msra.mxu1 %v6033_v43  ;;  %v6099_v43 = vld [vmem:[%s6615_s20] sm:$0xff]  }
  0x38   : > { %5556 = vmatpush3.bf16.msra.mxu0 %v6034_v44  ;;  %5341 = vmatprep.subr.bf16.mxu1 %v6035_v47  ;;  %v6101_v44 = vld [vmem:[%s6530_s14 + $0x8] sm:$0xff]  }
  0x39   : > { %5557 = vmatprep.subr.bf16.mxu0 %v6036_v48 }
  0x3a   : > { %5334 = vmatmul.mubr.msk.bf16.gmra.mrb[4].mxu1 %vm560_vm0, %v4534_v50  ;;  %v6104_v50 = vld [vmem:[%s6530_s14 + $0x10] sm:$0xff]  }
  0x3b   : > { %5342 = vmatpush3.bf16.msra.mxu1 %v6035_v47  ;;  %5550 = vmatmul.mubr.msk.bf16.gmra.mrb[4].mxu0 %vm560_vm0, %v6042_v51  ;;  %v6100_v47 = vld [vmem:[%s7010_s5 + $0xf0] sm:$0xff]   ;;  %v6105_v51 = vld [vmem:[%s7010_s5 + $0xf8] sm:$0xff]  }
  0x3c   : > { %5558 = vmatpush3.bf16.msra.mxu0 %v6036_v48  ;;  %5343 = vmatprep.subr.bf16.mxu1 %v6038_v49  ;;  %v6102_v48 = vld [vmem:[%s7010_s5 + $0x2d0] sm:$0xff]  }
  0x3d   : > { %5559 = vmatprep.subr.bf16.mxu0 %v6040_v52  ;;  %5347 = vmatprep.mubr.msk.bf16.mxu1 %vm560_vm0, %v6045_v53  ;;  %v6109_v53 = vld [vmem:[%s6615_s20 + $0x10] sm:$0xff]  }
  0x3e   : > { %5563 = vmatprep.mubr.msk.bf16.mxu0 %vm560_vm0, %v6047_v54  ;;  %v6111_v54 = vld [vmem:[%s6530_s14 + $0x18] sm:$0xff]  }
  0x3f   : > { %5344 = vmatpush3.bf16.msra.mxu1 %v6038_v49  ;;  %v6103_v49 = vld [vmem:[%s6615_s20 + $0x8] sm:$0xff]  }
  0x40   : > { %5560 = vmatpush3.bf16.msra.mxu0 %v6040_v52  ;;  %5345 = vmatprep.subr.bf16.mxu1 %v6043_v55  ;;  %v6106_v52 = vld [vmem:[%s7010_s5 + $0x2d8] sm:$0xff]  }
  0x41   : > { %5561 = vmatprep.subr.bf16.mxu0 %v6044_v56 }
  0x43   : > { %5346 = vmatpush3.bf16.msra.mxu1 %v6043_v55  ;;  %v6107_v55 = vld [vmem:[%s7010_s5 + $0x100] sm:$0xff]  }
  0x44   : > { %5562 = vmatpush3.bf16.msra.mxu0 %v6044_v56  ;;  %5355 = vmatprep.subr.bf16.mxu1 %v6046_v57  ;;  %v6108_v56 = vld [vmem:[%s7010_s5 + $0x2e0] sm:$0xff]  }
  0x45   : > { %5571 = vmatprep.subr.bf16.mxu0 %v6048_v58 }
  0x46   : > { %5348 = vmatmul.mubr.msk.bf16.vlgmr.msra.gmra.mrb[0].mxu1 %vm560_vm0, %v6049_v59  ;;  %v6114_v59 = vld [vmem:[%s6530_s14 + $0x20] sm:$0xff]  }
  0x47   : > { %5356 = vmatpush3.bf16.msra.mxu1 %v6046_v57  ;;  %5564 = vmatmul.mubr.msk.bf16.vlgmr.msra.gmra.mrb[0].mxu0 %vm560_vm0, %v6050_v60  ;;  %v6110_v57 = vld [vmem:[%s7010_s5 + $0x108] sm:$0xff]  }
  0x48   : > { %5572 = vmatpush3.bf16.msra.mxu0 %v6048_v58  ;;  %5357 = vmatprep.subr.bf16.mxu1 %v6051_v61  ;;  %v6113_v58 = vld [vmem:[%s6615_s20 + $0x18] sm:$0xff]   ;;  %v6112_v60 = vld [vmem:[%s7010_s5 + $0x2e8] sm:$0xff]  }
  0x49   : > { %5573 = vmatprep.subr.bf16.mxu0 %v6052_v62  ;;  %5351 = vmatprep.mubr.msk.bf16.mxu1 %vm560_vm0, %v6055_v63  ;;  %v6115_v63 = vld [vmem:[%s7010_s5 + $0x110] sm:$0xff]  }
  0x4a   : > { %5567 = vmatprep.mubr.msk.bf16.mxu0 %vm560_vm0, %v6057_v0  ;;  %v6116_v0 = vld [vmem:[%s7010_s5 + $0x2f0] sm:$0xff]  }
  0x4b   : > { %5358 = vmatpush3.bf16.msra.mxu1 %v6051_v61  ;;  %v6117_v61 = vld [vmem:[%s6615_s20 + $0x4] sm:$0xff]  }
  0x4c   : > { %5574 = vmatpush3.bf16.msra.mxu0 %v6052_v62  ;;  %5359 = vmatprep.subr.bf16.mxu1 %v6053_v1  ;;  %v6119_v62 = vld [vmem:[%s6530_s14 + $0xc] sm:$0xff]  }
  0x4d   : > { %5575 = vmatprep.subr.bf16.mxu0 %v6054_v2 }
  0x4e   : > { %5352 = vmatmul.mubr.msk.bf16.gmra.mrb[4].mxu1 %vm560_vm0, %v6059_v4  ;;  %v6122_v4 = vld [vmem:[%s6530_s14 + $0x14] sm:$0xff]  }
  0x4f   : > { %5360 = vmatpush3.bf16.msra.mxu1 %v6053_v1  ;;  %5568 = vmatmul.mubr.msk.bf16.gmra.mrb[4].mxu0 %vm560_vm0, %v6060_v5  ;;  %v6118_v1 = vld [vmem:[%s7010_s5 + $0x118] sm:$0xff]   ;;  %v6123_v5 = vld [vmem:[%s7010_s5 + $0x120] sm:$0xff]  }
  0x50   : > { %5576 = vmatpush3.bf16.msra.mxu0 %v6054_v2  ;;  %5361 = vmatprep.subr.bf16.mxu1 %v6056_v3  ;;  %v6120_v2 = vld [vmem:[%s7010_s5 + $0x2f8] sm:$0xff]  }
  0x51   : > { %5577 = vmatprep.subr.bf16.mxu0 %v6058_v6  ;;  %5365 = vmatprep.mubr.msk.bf16.mxu1 %vm560_vm0, %v6063_v7  ;;  %v6127_v7 = vld [vmem:[%s6615_s20 + $0x14] sm:$0xff]  }
  0x52   : > { %5581 = vmatprep.mubr.msk.bf16.mxu0 %vm560_vm0, %v6065_v8  ;;  %v6129_v8 = vld [vmem:[%s6530_s14 + $0x1c] sm:$0xff]  }
  0x53   : > { %5362 = vmatpush3.bf16.msra.mxu1 %v6056_v3  ;;  %v6121_v3 = vld [vmem:[%s6615_s20 + $0xc] sm:$0xff]  }
  0x54   : > { %5578 = vmatpush3.bf16.msra.mxu0 %v6058_v6  ;;  %5363 = vmatprep.subr.bf16.mxu1 %v6061_v9  ;;  %v6124_v6 = vld [vmem:[%s7010_s5 + $0x300] sm:$0xff]  }
  0x55   : > { %5579 = vmatprep.subr.bf16.mxu0 %v6062_v10 }
  0x57   : > { %5364 = vmatpush3.bf16.msra.mxu1 %v6061_v9  ;;  %v6125_v9 = vld [vmem:[%s7010_s5 + $0x128] sm:$0xff]  }
  0x58   : > { %5580 = vmatpush3.bf16.msra.mxu0 %v6062_v10  ;;  %5373 = vmatprep.subr.bf16.mxu1 %v6064_v11  ;;  %v6126_v10 = vld [vmem:[%s7010_s5 + $0x308] sm:$0xff]  }
  0x59   : > { %5589 = vmatprep.subr.bf16.mxu0 %v6066_v12 }
  0x5a   : > { %5366 = vmatmul.mubr.msk.bf16.vlgmr.msra.gmra.mrb[0].mxu1 %vm560_vm0, %v6067_v13  ;;  %v6132_v13 = vld [vmem:[%s6530_s14 + $0x24] sm:$0xff]  }
  0x5b   : > { %5374 = vmatpush3.bf16.msra.mxu1 %v6064_v11  ;;  %5582 = vmatmul.mubr.msk.bf16.vlgmr.msra.gmra.mrb[0].mxu0 %vm560_vm0, %v6068_v14  ;;  %v6128_v11 = vld [vmem:[%s7010_s5 + $0x130] sm:$0xff]  }
  0x5c   : > { %5590 = vmatpush3.bf16.msra.mxu0 %v6066_v12  ;;  %5375 = vmatprep.subr.bf16.mxu1 %v6069_v15  ;;  %v6131_v12 = vld [vmem:[%s6615_s20 + $0x1c] sm:$0xff]   ;;  %v6130_v14 = vld [vmem:[%s7010_s5 + $0x310] sm:$0xff]  }
  0x5d   : > { %5591 = vmatprep.subr.bf16.mxu0 %v6070_v16  ;;  %5369 = vmatprep.mubr.msk.bf16.mxu1 %vm560_vm0, %v6073_v17  ;;  %v6133_v17 = vld [vmem:[%s7010_s5 + $0x138] sm:$0xff]  }
  0x5e   : > { %5585 = vmatprep.mubr.msk.bf16.mxu0 %vm560_vm0, %v6075_v18  ;;  %v6134_v18 = vld [vmem:[%s7010_s5 + $0x318] sm:$0xff]  }
  0x5f   : > { %5376 = vmatpush3.bf16.msra.mxu1 %v6069_v15  ;;  %v6135_v15 = vld [vmem:[%s6615_s20 + $0x8] sm:$0xff]  }
  0x60   : > { %5592 = vmatpush3.bf16.msra.mxu0 %v6070_v16  ;;  %5377 = vmatprep.subr.bf16.mxu1 %v6071_v19  ;;  %v6137_v16 = vld [vmem:[%s6530_s14 + $0x10] sm:$0xff]  }
  0x61   : > { %5593 = vmatprep.subr.bf16.mxu0 %v6072_v20 }
  0x62   : > { %5370 = vmatmul.mubr.msk.bf16.gmra.mrb[4].mxu1 %vm560_vm0, %v6077_v22  ;;  %v6140_v22 = vld [vmem:[%s6530_s14 + $0x18] sm:$0xff]  }
  0x63   : > { %5378 = vmatpush3.bf16.msra.mxu1 %v6071_v19  ;;  %5586 = vmatmul.mubr.msk.bf16.gmra.mrb[4].mxu0 %vm560_vm0, %v6078_v23  ;;  %v6136_v19 = vld [vmem:[%s7010_s5 + $0x140] sm:$0xff]   ;;  %v6141_v23 = vld [vmem:[%s7010_s5 + $0x148] sm:$0xff]  }
  0x64   : > { %5594 = vmatpush3.bf16.msra.mxu0 %v6072_v20  ;;  %5379 = vmatprep.subr.bf16.mxu1 %v6074_v21  ;;  %v6138_v20 = vld [vmem:[%s7010_s5 + $0x320] sm:$0xff]  }
  0x65   : > { %5595 = vmatprep.subr.bf16.mxu0 %v6076_v24  ;;  %5383 = vmatprep.mubr.msk.bf16.mxu1 %vm560_vm0, %v6081_v25  ;;  %v6145_v25 = vld [vmem:[%s6615_s20 + $0x18] sm:$0xff]  }
  0x66   : > { %5599 = vmatprep.mubr.msk.bf16.mxu0 %vm560_vm0, %v6083_v26  ;;  %v6147_v26 = vld [vmem:[%s6530_s14 + $0x20] sm:$0xff]  }
  0x67   : > { %5380 = vmatpush3.bf16.msra.mxu1 %v6074_v21  ;;  %v6139_v21 = vld [vmem:[%s6615_s20 + $0x10] sm:$0xff]  }
  0x68   : > { %5596 = vmatpush3.bf16.msra.mxu0 %v6076_v24  ;;  %5381 = vmatprep.subr.bf16.mxu1 %v6079_v27  ;;  %v6142_v24 = vld [vmem:[%s7010_s5 + $0x328] sm:$0xff]  }
  0x69   : > { %5597 = vmatprep.subr.bf16.mxu0 %v6080_v28 }
  0x6b   : > { %5382 = vmatpush3.bf16.msra.mxu1 %v6079_v27  ;;  %v6143_v27 = vld [vmem:[%s7010_s5 + $0x150] sm:$0xff]  }
  0x6c   : > { %5598 = vmatpush3.bf16.msra.mxu0 %v6080_v28  ;;  %5391 = vmatprep.subr.bf16.mxu1 %v6082_v29  ;;  %v6144_v28 = vld [vmem:[%s7010_s5 + $0x330] sm:$0xff]  }
  0x6d   : > { %5607 = vmatprep.subr.bf16.mxu0 %v6084_v30 }
  0x6e   : > { %5384 = vmatmul.mubr.msk.bf16.vlgmr.msra.gmra.mrb[0].mxu1 %vm560_vm0, %v6085_v31  ;;  %v6150_v31 = vld [vmem:[%s6530_s14 + $0x28] sm:$0xff]  }
  0x6f   : > { %5392 = vmatpush3.bf16.msra.mxu1 %v6082_v29  ;;  %5600 = vmatmul.mubr.msk.bf16.vlgmr.msra.gmra.mrb[0].mxu0 %vm560_vm0, %v6086_v32  ;;  %v6146_v29 = vld [vmem:[%s7010_s5 + $0x158] sm:$0xff]  }
  0x70   : > { %5608 = vmatpush3.bf16.msra.mxu0 %v6084_v30  ;;  %5393 = vmatprep.subr.bf16.mxu1 %v6087_v33  ;;  %v6149_v30 = vld [vmem:[%s6615_s20 + $0x20] sm:$0xff]   ;;  %v6148_v32 = vld [vmem:[%s7010_s5 + $0x338] sm:$0xff]  }
  0x71   : > { %5609 = vmatprep.subr.bf16.mxu0 %v6088_v34  ;;  %5387 = vmatprep.mubr.msk.bf16.mxu1 %vm560_vm0, %v6091_v35  ;;  %v6151_v35 = vld [vmem:[%s7010_s5 + $0x160] sm:$0xff]  }
  0x72   : > { %5603 = vmatprep.mubr.msk.bf16.mxu0 %vm560_vm0, %v6093_v36  ;;  %v6152_v36 = vld [vmem:[%s7010_s5 + $0x340] sm:$0xff]  }
  0x73   : > { %5394 = vmatpush3.bf16.msra.mxu1 %v6087_v33  ;;  %v6153_v33 = vld [vmem:[%s6615_s20 + $0xc] sm:$0xff]  }
  0x74   : > { %5610 = vmatpush3.bf16.msra.mxu0 %v6088_v34  ;;  %5395 = vmatprep.subr.bf16.mxu1 %v6089_v37  ;;  %v6155_v34 = vld [vmem:[%s6751_s23] sm:$0xff]  }
  0x75   : > { %5611 = vmatprep.subr.bf16.mxu0 %v6090_v38 }
  0x76   : > { %5388 = vmatmul.mubr.msk.bf16.gmra.mrb[4].mxu1 %vm560_vm0, %v6095_v40  ;;  %v6158_v40 = vld [vmem:[%s6751_s23 + $0x8] sm:$0xff]  }
  0x77   : > { %5396 = vmatpush3.bf16.msra.mxu1 %v6089_v37  ;;  %5604 = vmatmul.mubr.msk.bf16.gmra.mrb[4].mxu0 %vm560_vm0, %v6096_v41  ;;  %v6154_v37 = vld [vmem:[%s7010_s5 + $0x168] sm:$0xff]   ;;  %v6159_v41 = vld [vmem:[%s7010_s5 + $0x170] sm:$0xff]  }
  0x78   : > { %5612 = vmatpush3.bf16.msra.mxu0 %v6090_v38  ;;  %5397 = vmatprep.subr.bf16.mxu1 %v6092_v39  ;;  %v6156_v38 = vld [vmem:[%s7010_s5 + $0x348] sm:$0xff]  }
  0x79   : > { %5613 = vmatprep.subr.bf16.mxu0 %v6094_v42  ;;  %5401 = vmatprep.mubr.msk.bf16.mxu1 %vm560_vm0, %v6099_v43  ;;  %v6163_v43 = vld [vmem:[%s6615_s20 + $0x1c] sm:$0xff]  }
  0x7a   : > { %5617 = vmatprep.mubr.msk.bf16.mxu0 %vm560_vm0, %v6101_v44  ;;  %v6165_v44 = vld [vmem:[%s6751_s23 + $0x10] sm:$0xff]  }
  0x7b   : > { %5398 = vmatpush3.bf16.msra.mxu1 %v6092_v39  ;;  %v6157_v39 = vld [vmem:[%s6615_s20 + $0x14] sm:$0xff]  }
  0x7c   : > { %5614 = vmatpush3.bf16.msra.mxu0 %v6094_v42  ;;  %5399 = vmatprep.subr.bf16.mxu1 %v6097_v45  ;;  %v6160_v42 = vld [vmem:[%s7010_s5 + $0x350] sm:$0xff]  }
  0x7d   : > { %5615 = vmatprep.subr.bf16.mxu0 %v6098_v46 }
  0x7f   : > { %5400 = vmatpush3.bf16.msra.mxu1 %v6097_v45  ;;  %v6161_v45 = vld [vmem:[%s7010_s5 + $0x178] sm:$0xff]  }
  0x80   : > { %5616 = vmatpush3.bf16.msra.mxu0 %v6098_v46  ;;  %5409 = vmatprep.subr.bf16.mxu1 %v6100_v47  ;;  %v6162_v46 = vld [vmem:[%s7010_s5 + $0x358] sm:$0xff]  }
  0x81   : > { %5625 = vmatprep.subr.bf16.mxu0 %v6102_v48 }
  0x82   : > { %5402 = vmatmul.mubr.msk.bf16.vlgmr.msra.gmra.mrb[0].mxu1 %vm560_vm0, %v6103_v49  ;;  %v6168_v49 = vld [vmem:[%s6751_s23 + $0x18] sm:$0xff]  }
  0x83   : > { %5410 = vmatpush3.bf16.msra.mxu1 %v6100_v47  ;;  %5618 = vmatmul.mubr.msk.bf16.vlgmr.msra.gmra.mrb[0].mxu0 %vm560_vm0, %v6104_v50  ;;  %v6164_v47 = vld [vmem:[%s7010_s5 + $0x180] sm:$0xff]  }
  0x84   : > { %5626 = vmatpush3.bf16.msra.mxu0 %v6102_v48  ;;  %5411 = vmatprep.subr.bf16.mxu1 %v6105_v51  ;;  %v6167_v48 = vld [vmem:[%s6615_s20 + $0x24] sm:$0xff]  }
  0x85   : > { %5627 = vmatprep.subr.bf16.mxu0 %v6106_v52  ;;  %5405 = vmatprep.mubr.msk.bf16.mxu1 %vm560_vm0, %v6109_v53  ;;  %v6166_v50 = vld [vmem:[%s7010_s5 + $0x360] sm:$0xff]   ;;  %v6169_v53 = vld [vmem:[%s7010_s5 + $0x188] sm:$0xff]  }
  0x86   : > { %5621 = vmatprep.mubr.msk.bf16.mxu0 %vm560_vm0, %v6111_v54  ;;  %v6170_v54 = vld [vmem:[%s7010_s5 + $0x368] sm:$0xff]  }
  0x87   : > { %5412 = vmatpush3.bf16.msra.mxu1 %v6105_v51  ;;  %v6171_v51 = vld [vmem:[%s6615_s20 + $0x10] sm:$0xff]  }
  0x88   : > { %5628 = vmatpush3.bf16.msra.mxu0 %v6106_v52  ;;  %5413 = vmatprep.subr.bf16.mxu1 %v6107_v55  ;;  %v6173_v52 = vld [vmem:[%s6751_s23 + $0x4] sm:$0xff]  }
  0x89   : > { %5629 = vmatprep.subr.bf16.mxu0 %v6108_v56 }
  0x8a   : > { %5406 = vmatmul.mubr.msk.bf16.gmra.mrb[4].mxu1 %vm560_vm0, %v6113_v58  ;;  %v6176_v58 = vld [vmem:[%s6751_s23 + $0xc] sm:$0xff]  }
  0x8b   : > { %5414 = vmatpush3.bf16.msra.mxu1 %v6107_v55  ;;  %5622 = vmatmul.mubr.msk.bf16.gmra.mrb[4].mxu0 %vm560_vm0, %v6114_v59  ;;  %v6172_v55 = vld [vmem:[%s7010_s5 + $0x190] sm:$0xff]   ;;  %v6177_v59 = vld [vmem:[%s7010_s5 + $0x198] sm:$0xff]  }
  0x8c   : > { %5630 = vmatpush3.bf16.msra.mxu0 %v6108_v56  ;;  %5415 = vmatprep.subr.bf16.mxu1 %v6110_v57  ;;  %v6174_v56 = vld [vmem:[%s7010_s5 + $0x370] sm:$0xff]  }
  0x8d   : > { %5631 = vmatprep.subr.bf16.mxu0 %v6112_v60  ;;  %5419 = vmatprep.mubr.msk.bf16.mxu1 %vm560_vm0, %v6117_v61  ;;  %v6181_v61 = vld [vmem:[%s6615_s20 + $0x20] sm:$0xff]  }
  0x8e   : > { %5635 = vmatprep.mubr.msk.bf16.mxu0 %vm560_vm0, %v6119_v62  ;;  %v6183_v62 = vld [vmem:[%s6751_s23 + $0x14] sm:$0xff]  }
  0x8f   : > { %5416 = vmatpush3.bf16.msra.mxu1 %v6110_v57  ;;  %v6175_v57 = vld [vmem:[%s6615_s20 + $0x18] sm:$0xff]  }
  0x90   : > { %5632 = vmatpush3.bf16.msra.mxu0 %v6112_v60  ;;  %5417 = vmatprep.subr.bf16.mxu1 %v6115_v63  ;;  %v6178_v60 = vld [vmem:[%s7010_s5 + $0x378] sm:$0xff]  }
  0x91   : > { %5633 = vmatprep.subr.bf16.mxu0 %v6116_v0 }
  0x93   : > { %5418 = vmatpush3.bf16.msra.mxu1 %v6115_v63  ;;  %v6179_v63 = vld [vmem:[%s7010_s5 + $0x1a0] sm:$0xff]  }
  0x94   : > { %5634 = vmatpush3.bf16.msra.mxu0 %v6116_v0  ;;  %5427 = vmatprep.subr.bf16.mxu1 %v6118_v1  ;;  %v6180_v0 = vld [vmem:[%s7010_s5 + $0x380] sm:$0xff]  }
  0x95   : > { %5643 = vmatprep.subr.bf16.mxu0 %v6120_v2 }
  0x96   : > { %5420 = vmatmul.mubr.msk.bf16.vlgmr.msra.gmra.mrb[0].mxu1 %vm560_vm0, %v6121_v3  ;;  %v6186_v3 = vld [vmem:[%s6751_s23 + $0x1c] sm:$0xff]  }
  0x97   : > { %5428 = vmatpush3.bf16.msra.mxu1 %v6118_v1  ;;  %5636 = vmatmul.mubr.msk.bf16.vlgmr.msra.gmra.mrb[0].mxu0 %vm560_vm0, %v6122_v4  ;;  %v6182_v1 = vld [vmem:[%s7010_s5 + $0x1a8] sm:$0xff]  }
  0x98   : > { %5644 = vmatpush3.bf16.msra.mxu0 %v6120_v2  ;;  %5429 = vmatprep.subr.bf16.mxu1 %v6123_v5  ;;  %v6185_v2 = vld [vmem:[%s6615_s20 + $0x28] sm:$0xff]  }
  0x99   : > { %5645 = vmatprep.subr.bf16.mxu0 %v6124_v6  ;;  %5423 = vmatprep.mubr.msk.bf16.mxu1 %vm560_vm0, %v6127_v7  ;;  %v6184_v4 = vld [vmem:[%s7010_s5 + $0x388] sm:$0xff]   ;;  %v6187_v7 = vld [vmem:[%s7010_s5 + $0x1b0] sm:$0xff]  }
  0x9a   : > { %5639 = vmatprep.mubr.msk.bf16.mxu0 %vm560_vm0, %v6129_v8  ;;  %v6188_v8 = vld [vmem:[%s7010_s5 + $0x390] sm:$0xff]  }
  0x9b   : > { %5430 = vmatpush3.bf16.msra.mxu1 %v6123_v5  ;;  %v6189_v5 = vld [vmem:[%s6413_s18] sm:$0xff]  }
  0x9c   : > { %5646 = vmatpush3.bf16.msra.mxu0 %v6124_v6  ;;  %5431 = vmatprep.subr.bf16.mxu1 %v6125_v9  ;;  %v6191_v6 = vld [vmem:[%s6751_s23 + $0x8] sm:$0xff]  }
  0x9d   : > { %5647 = vmatprep.subr.bf16.mxu0 %v6126_v10 }
  0x9e   : > { %5424 = vmatmul.mubr.msk.bf16.gmra.mrb[4].mxu1 %vm560_vm0, %v6131_v12  ;;  %v6194_v12 = vld [vmem:[%s6751_s23 + $0x10] sm:$0xff]  }
  0x9f   : > { %5432 = vmatpush3.bf16.msra.mxu1 %v6125_v9  ;;  %5640 = vmatmul.mubr.msk.bf16.gmra.mrb[4].mxu0 %vm560_vm0, %v6132_v13  ;;  %v6190_v9 = vld [vmem:[%s7010_s5 + $0x1b8] sm:$0xff]   ;;  %v6195_v13 = vld [vmem:[%s7010_s5 + $0x1c0] sm:$0xff]  }
  0xa0   : > { %5648 = vmatpush3.bf16.msra.mxu0 %v6126_v10  ;;  %5433 = vmatprep.subr.bf16.mxu1 %v6128_v11  ;;  %v6192_v10 = vld [vmem:[%s7010_s5 + $0x398] sm:$0xff]  }
  0xa1   : > { %5649 = vmatprep.subr.bf16.mxu0 %v6130_v14  ;;  %5437 = vmatprep.mubr.msk.bf16.mxu1 %vm560_vm0, %v6135_v15  ;;  %v6199_v15 = vld [vmem:[%s6413_s18 + $0x10] sm:$0xff]  }
  0xa2   : > { %5653 = vmatprep.mubr.msk.bf16.mxu0 %vm560_vm0, %v6137_v16  ;;  %v6200_v16 = vld [vmem:[%s6751_s23 + $0x18] sm:$0xff]  }
  0xa3   : > { %5434 = vmatpush3.bf16.msra.mxu1 %v6128_v11  ;;  %v6193_v11 = vld [vmem:[%s6413_s18 + $0x8] sm:$0xff]  }
  0xa4   : > { %5650 = vmatpush3.bf16.msra.mxu0 %v6130_v14  ;;  %5435 = vmatprep.subr.bf16.mxu1 %v6133_v17  ;;  %v6196_v14 = vld [vmem:[%s7010_s5 + $0x3a0] sm:$0xff]  }
  0xa5   : > { %5651 = vmatprep.subr.bf16.mxu0 %v6134_v18 }
  0xa7   : > { %5436 = vmatpush3.bf16.msra.mxu1 %v6133_v17  ;;  %v6197_v17 = vld [vmem:[%s7010_s5 + $0x1c8] sm:$0xff]  }
  0xa8   : > { %5652 = vmatpush3.bf16.msra.mxu0 %v6134_v18  ;;  %5445 = vmatprep.subr.bf16.mxu1 %v6136_v19  ;;  %v6198_v18 = vld [vmem:[%s7010_s5 + $0x3a8] sm:$0xff]  }
  0xa9   : > { %5661 = vmatprep.subr.bf16.mxu0 %v6138_v20 }
  0xaa   : > { %5438 = vmatmul.mubr.msk.bf16.vlgmr.msra.gmra.mrb[0].mxu1 %vm560_vm0, %v6139_v21  ;;  %v6202_v21 = vld [vmem:[%s7010_s5 + $0x1d0] sm:$0xff]  }
  0xab   : > { %5446 = vmatpush3.bf16.msra.mxu1 %v6136_v19  ;;  %5654 = vmatmul.mubr.msk.bf16.vlgmr.msra.gmra.mrb[0].mxu0 %vm560_vm0, %v6140_v22  ;;  %v6201_v19 = vld [vmem:[%s6413_s18 + $0x18] sm:$0xff]   ;;  %v6204_v22 = vld [vmem:[%s7010_s5 + $0x3b0] sm:$0xff]  }
  0xac   : > { %5662 = vmatpush3.bf16.msra.mxu0 %v6138_v20  ;;  %5447 = vmatprep.subr.bf16.mxu1 %v6141_v23  ;;  %v6203_v20 = vld [vmem:[%s6751_s23 + $0x20] sm:$0xff]  }
  0xad   : > { %5663 = vmatprep.subr.bf16.mxu0 %v6142_v24  ;;  %5441 = vmatprep.mubr.msk.bf16.mxu1 %vm560_vm0, %v6145_v25  ;;  %v6205_v25 = vld [vmem:[%s7010_s5 + $0x1d8] sm:$0xff]  }
  0xae   : > { %5657 = vmatprep.mubr.msk.bf16.mxu0 %vm560_vm0, %v6147_v26  ;;  %v6206_v26 = vld [vmem:[%s7010_s5 + $0x3b8] sm:$0xff]  }
  0xaf   : > { %5448 = vmatpush3.bf16.msra.mxu1 %v6141_v23  ;;  %v6207_v23 = vld [vmem:[%s6413_s18 + $0x4] sm:$0xff]  }
  0xb0   : > { %5664 = vmatpush3.bf16.msra.mxu0 %v6142_v24  ;;  %5449 = vmatprep.subr.bf16.mxu1 %v6143_v27  ;;  %v6208_v24 = vld [vmem:[%s6751_s23 + $0xc] sm:$0xff]  }
  0xb1   : > { %5665 = vmatprep.subr.bf16.mxu0 %v6144_v28 }
  0xb2   : > { %5442 = vmatmul.mubr.msk.bf16.gmra.mrb[4].mxu1 %vm560_vm0, %v6149_v30  ;;  %v6212_v30 = vld [vmem:[%s7010_s5 + $0x3c8] sm:$0xff]  }
  0xb3   : > { %5450 = vmatpush3.bf16.msra.mxu1 %v6143_v27  ;;  %5658 = vmatmul.mubr.msk.bf16.gmra.mrb[4].mxu0 %vm560_vm0, %v6150_v31  ;;  %v6211_v27 = vld [vmem:[%s7010_s5 + $0x3c0] sm:$0xff]   ;;  %v6213_v31 = vld [vmem:[%s6413_s18 + $0x14] sm:$0xff]  }
  0xb4   : > { %5666 = vmatpush3.bf16.msra.mxu0 %v6144_v28  ;;  %5451 = vmatprep.subr.bf16.mxu1 %v6146_v29  ;;  %v6209_v28 = vld [vmem:[%s6413_s18 + $0xc] sm:$0xff]  }
  0xb5   : > { %5667 = vmatprep.subr.bf16.mxu0 %v6148_v32  ;;  %5455 = vmatprep.mubr.msk.bf16.mxu1 %vm560_vm0, %v6153_v33  ;;  %v6217_v33 = vld [vmem:[%s7010_s5 + $0x3d0] sm:$0xff]  }
  0xb6   : > { %5671 = vmatprep.mubr.msk.bf16.mxu0 %vm560_vm0, %v6155_v34  ;;  %v6215_v34 = vld [vmem:[%s6413_s18 + $0x1c] sm:$0xff]  }
  0xb7   : > { %5452 = vmatpush3.bf16.msra.mxu1 %v6146_v29  ;;  %v6210_v29 = vld [vmem:[%s6751_s23 + $0x14] sm:$0xff]  }
  0xb8   : > { %5668 = vmatpush3.bf16.msra.mxu0 %v6148_v32  ;;  %5453 = vmatprep.subr.bf16.mxu1 %v6151_v35  ;;  %v6214_v32 = vld [vmem:[%s6751_s23 + $0x1c] sm:$0xff]  }
  0xb9   : > { %5669 = vmatprep.subr.bf16.mxu0 %v6152_v36 }
  0xbb   : > { %5454 = vmatpush3.bf16.msra.mxu1 %v6151_v35  ;;  %v6216_v35 = vld [vmem:[%s6751_s23 + $0x24] sm:$0xff]  }
  0xbc   : > { %5670 = vmatpush3.bf16.msra.mxu0 %v6152_v36  ;;  %5463 = vmatprep.subr.bf16.mxu1 %v6154_v37  ;;  %v6218_v36 = vld [vmem:[%s7010_s5 + $0x3d8] sm:$0xff]  }
  0xbd   : > { %5679 = vmatprep.subr.bf16.mxu0 %v6156_v38 }
  0xbe   : > { %5456 = vmatmul.mubr.msk.bf16.vlgmr.msra.gmra.mrb[0].mxu1 %vm560_vm0, %v6157_v39  ;;  %v6219_v39 = vld [vmem:[%s7010_s5 + $0x3e0] sm:$0xff]  }
  0xbf   : > { %5464 = vmatpush3.bf16.msra.mxu1 %v6154_v37  ;;  %5672 = vmatmul.mubr.msk.bf16.vlgmr.msra.gmra.mrb[0].mxu0 %vm560_vm0, %v6158_v40  ;;  %v6220_v37 = vld [vmem:[%s6751_s23 + $0x10] sm:$0xff]   ;;  %v6223_v40 = vld [vmem:[%s6751_s23 + $0x28] sm:$0xff]  }
  0xc0   : > { %5680 = vmatpush3.bf16.msra.mxu0 %v6156_v38  ;;  %5465 = vmatprep.subr.bf16.mxu1 %v6159_v41  ;;  %v6221_v38 = vld [vmem:[%s6751_s23 + $0x20] sm:$0xff]  }
  0xc1   : > { %5681 = vmatprep.subr.bf16.mxu0 %v6160_v42  ;;  %5459 = vmatprep.mubr.msk.bf16.mxu1 %vm560_vm0, %v6163_v43 }
  0xc2   : > { %5675 = vmatprep.mubr.msk.bf16.mxu0 %vm560_vm0, %v6165_v44 }
  0xc3   : > { %5466 = vmatpush3.bf16.msra.mxu1 %v6159_v41  ;;  %v6222_v41 = vld [vmem:[%s6751_s23 + $0x18] sm:$0xff]   ;;  %s4505_s23 = sshll.u32 %s7034_s24, 3 }
  0xc4   : > { %5682 = vmatpush3.bf16.msra.mxu0 %v6160_v42  ;;  %5467 = vmatprep.subr.bf16.mxu1 %v6161_v45  ;;  %s476_s15 = sadd.s32 %s4506_s10, %s4505_s23 }
  0xc5   : > { %5683 = vmatprep.subr.bf16.mxu0 %v6162_v46  ;;  %s4507_s11 = sshll.u32 %s476_s15, 3 }
  0xc6   : > { %5460 = vmatmul.mubr.msk.bf16.gmra.mrb[4].mxu1 %vm560_vm0, %v6167_v48  ;;  %s478_s16 = scalar_lea.vmem %s7012_s7, %s4507_s11 }
  0xc7   : > { %5468 = vmatpush3.bf16.msra.mxu1 %v6161_v45  ;;  %5676 = vmatmul.mubr.msk.bf16.gmra.mrb[4].mxu0 %vm560_vm0, %v6168_v49 }
  0xc8   : > { %5684 = vmatpush3.bf16.msra.mxu0 %v6162_v46  ;;  %5469 = vmatprep.subr.bf16.mxu1 %v6164_v47 }
  0xc9   : > { %5685 = vmatprep.subr.bf16.mxu0 %v6166_v50  ;;  %5473 = vmatprep.mubr.msk.bf16.mxu1 %vm560_vm0, %v6171_v51 }
  0xca   : > { %5689 = vmatprep.mubr.msk.bf16.mxu0 %vm560_vm0, %v6173_v52 }
  0xcb   : > { %5470 = vmatpush3.bf16.msra.mxu1 %v6164_v47 }
  0xcc   : > { %5686 = vmatpush3.bf16.msra.mxu0 %v6166_v50  ;;  %5471 = vmatprep.subr.bf16.mxu1 %v6169_v53 }
  0xcd   : > { %5687 = vmatprep.subr.bf16.mxu0 %v6170_v54 }
  0xcf   : > { %5472 = vmatpush3.bf16.msra.mxu1 %v6169_v53 }
  0xd0   : > { %5688 = vmatpush3.bf16.msra.mxu0 %v6170_v54  ;;  %5481 = vmatprep.subr.bf16.mxu1 %v6172_v55 }
  0xd1   : > { %5697 = vmatprep.subr.bf16.mxu0 %v6174_v56 }
  0xd2   : > { %5474 = vmatmul.mubr.msk.bf16.vlgmr.msra.gmra.mrb[0].mxu1 %vm560_vm0, %v6175_v57 }
  0xd3   : > { %5482 = vmatpush3.bf16.msra.mxu1 %v6172_v55  ;;  %5690 = vmatmul.mubr.msk.bf16.vlgmr.msra.gmra.mrb[0].mxu0 %vm560_vm0, %v6176_v58  ;;  %v5073_v58 = vld [vmem:[%s7011_s6] ss:$0 sm:$0xff] }
  0xd4   : > { %5698 = vmatpush3.bf16.msra.mxu0 %v6174_v56  ;;  %5483 = vmatprep.subr.bf16.mxu1 %v6177_v59 }
  0xd5   : > { %5699 = vmatprep.subr.bf16.mxu0 %v6178_v60  ;;  %5477 = vmatprep.mubr.msk.bf16.mxu1 %vm560_vm0, %v6181_v61 }
  0xd6   : > { %5693 = vmatprep.mubr.msk.bf16.mxu0 %vm560_vm0, %v6183_v62 }
  0xd7   : > { %5484 = vmatpush3.bf16.msra.mxu1 %v6177_v59 }
  0xd8   : > { %5700 = vmatpush3.bf16.msra.mxu0 %v6178_v60  ;;  %5485 = vmatprep.subr.bf16.mxu1 %v6179_v63 }
  0xd9   : > { %5701 = vmatprep.subr.bf16.mxu0 %v6180_v0 }
  0xda   : > { %5478 = vmatmul.mubr.msk.bf16.gmra.mrb[4].mxu1 %vm560_vm0, %v6185_v2 }
  0xdb   : > { %5486 = vmatpush3.bf16.msra.mxu1 %v6179_v63  ;;  %5694 = vmatmul.mubr.msk.bf16.gmra.mrb[4].mxu0 %vm560_vm0, %v6186_v3 }
  0xdc   : > { %5702 = vmatpush3.bf16.msra.mxu0 %v6180_v0  ;;  %5487 = vmatprep.subr.bf16.mxu1 %v6182_v1 }
  0xdd   : > { %5703 = vmatprep.subr.bf16.mxu0 %v6184_v4  ;;  %5491 = vmatprep.mubr.msk.bf16.mxu1 %vm560_vm0, %v6189_v5 }
  0xde   : > { %5707 = vmatprep.mubr.msk.bf16.mxu0 %vm560_vm0, %v6191_v6 }
  0xdf   : > { %5488 = vmatpush3.bf16.msra.mxu1 %v6182_v1 }
  0xe0   : > { %5704 = vmatpush3.bf16.msra.mxu0 %v6184_v4  ;;  %5489 = vmatprep.subr.bf16.mxu1 %v6187_v7 }
  0xe1   : > { %5705 = vmatprep.subr.bf16.mxu0 %v6188_v8 }
  0xe3   : > { %5490 = vmatpush3.bf16.msra.mxu1 %v6187_v7 }
  0xe4   : > { %5706 = vmatpush3.bf16.msra.mxu0 %v6188_v8  ;;  %5499 = vmatprep.subr.bf16.mxu1 %v6190_v9 }
  0xe5   : > { %5715 = vmatprep.subr.bf16.mxu0 %v6192_v10 }
  0xe6   : > { %5492 = vmatmul.mubr.msk.bf16.vlgmr.msra.gmra.mrb[0].mxu1 %vm560_vm0, %v6193_v11 }
  0xe7   : > { %5500 = vmatpush3.bf16.msra.mxu1 %v6190_v9  ;;  %5708 = vmatmul.mubr.msk.bf16.vlgmr.msra.gmra.mrb[0].mxu0 %vm560_vm0, %v6194_v12 }
  0xe8   : > { %5716 = vmatpush3.bf16.msra.mxu0 %v6192_v10  ;;  %5501 = vmatprep.subr.bf16.mxu1 %v6195_v13 }
  0xe9   : > { %5717 = vmatprep.subr.bf16.mxu0 %v6196_v14  ;;  %5495 = vmatprep.mubr.msk.bf16.mxu1 %vm560_vm0, %v6199_v15 }
  0xea   : > { %5711 = vmatprep.mubr.msk.bf16.mxu0 %vm560_vm0, %v6200_v16 }
  0xeb   : > { %5502 = vmatpush3.bf16.msra.mxu1 %v6195_v13 }
  0xec   : > { %5718 = vmatpush3.bf16.msra.mxu0 %v6196_v14  ;;  %5503 = vmatprep.subr.bf16.mxu1 %v6197_v17 }
  0xed   : > { %5719 = vmatprep.subr.bf16.mxu0 %v6198_v18 }
  0xee   : > { %5496 = vmatmul.mubr.msk.bf16.gmra.mrb[4].mxu1 %vm560_vm0, %v6201_v19 }
  0xef   : > { %5504 = vmatpush3.bf16.msra.mxu1 %v6197_v17  ;;  %5712 = vmatmul.mubr.msk.bf16.gmra.mrb[4].mxu0 %vm560_vm0, %v6203_v20 }
  0xf0   : > { %5720 = vmatpush3.bf16.msra.mxu0 %v6198_v18  ;;  %5505 = vmatprep.subr.bf16.mxu1 %v6202_v21 }
  0xf1   : > { %5721 = vmatprep.subr.bf16.mxu0 %v6204_v22  ;;  %5509 = vmatprep.mubr.msk.bf16.mxu1 %vm560_vm0, %v6207_v23 }
  0xf2   : > { %5725 = vmatprep.mubr.msk.bf16.mxu0 %vm560_vm0, %v6208_v24 }
  0xf3   : > { %5506 = vmatpush3.bf16.msra.mxu1 %v6202_v21 }
  0xf4   : > { %5722 = vmatpush3.bf16.msra.mxu0 %v6204_v22  ;;  %5507 = vmatprep.subr.bf16.mxu1 %v6205_v25 }
  0xf5   : > { %5723 = vmatprep.subr.bf16.mxu0 %v6206_v26 }
  0xf7   : > { %5508 = vmatpush3.bf16.msra.mxu1 %v6205_v25 }
  0xf8   : > { %5724 = vmatpush3.bf16.msra.mxu0 %v6206_v26  ;;  %5751 = vmatprep.subr.bf16.mxu1 %v6211_v27 }
  0xf9   : > { %5733 = vmatprep.subr.bf16.mxu0 %v6211_v27 }
  0xfa   : > { %5510 = vmatmul.mubr.msk.bf16.vlgmr.msra.gmra.mrb[0].mxu1 %vm560_vm0, %v6209_v28 }
  0xfb   : > { %5726 = vmatmul.mubr.msk.bf16.vlgmr.msra.gmra.mrb[0].mxu0 %vm560_vm0, %v6210_v29  ;;  %5756 = vmatpush3.bf16.msra.mxu1 %v6211_v27 }
  0xfc   : > { %5734 = vmatpush3.bf16.msra.mxu0 %v6211_v27  ;;  %5752 = vmatprep.subr.bf16.mxu1 %v6212_v30 }
  0xfd   : > { %5735 = vmatprep.subr.bf16.mxu0 %v6212_v30  ;;  %5513 = vmatprep.mubr.msk.bf16.mxu1 %vm560_vm0, %v6213_v31 }
  0xfe   : > { %5729 = vmatprep.mubr.msk.bf16.mxu0 %vm560_vm0, %v6214_v32 }
  0xff   : > { %5757 = vmatpush3.bf16.msra.mxu1 %v6212_v30 }
 0x100   : > { %5736 = vmatpush3.bf16.msra.mxu0 %v6212_v30  ;;  %5753 = vmatprep.subr.bf16.mxu1 %v6217_v33 }
 0x101   : > { %5737 = vmatprep.subr.bf16.mxu0 %v6217_v33 }
 0x102   : > { %5514 = vmatmul.mubr.msk.bf16.gmra.mrb[4].mxu1 %vm560_vm0, %v6215_v34 }
 0x103   : > { %5730 = vmatmul.mubr.msk.bf16.gmra.mrb[4].mxu0 %vm560_vm0, %v6216_v35  ;;  %5758 = vmatpush3.bf16.msra.mxu1 %v6217_v33 }
 0x104   : > { %5738 = vmatpush3.bf16.msra.mxu0 %v6217_v33  ;;  %5754 = vmatprep.subr.bf16.mxu1 %v6218_v36 }
 0x105   : > { %5739 = vmatprep.subr.bf16.mxu0 %v6218_v36  ;;  %5743 = vmatprep.mubr.msk.bf16.mxu0 %vm560_vm0, %v6220_v37 }
 0x106   : > { %5747 = vmatprep.mubr.msk.bf16.mxu1 %vm560_vm0, %v6221_v38 }
 0x107   : > { %5759 = vmatpush3.bf16.msra.mxu1 %v6218_v36 }
 0x108   : > { %5740 = vmatpush3.bf16.msra.mxu0 %v6218_v36  ;;  %5755 = vmatprep.subr.bf16.mxu1 %v6219_v39 }
 0x109   : > { %5741 = vmatprep.subr.bf16.mxu0 %v6219_v39 }
 0x10b   : > { %5760 = vmatpush3.bf16.msra.mxu1 %v6219_v39 }
 0x10c   : > { %5742 = vmatpush3.bf16.msra.mxu0 %v6219_v39 }
 0x10e   : > { %5748 = vmatmul.mubr.msk.bf16.vlgmr.msra.gmra.mrb[8].mxu1 %vm560_vm0, %v6223_v40 }
 0x10f   : > { %5744 = vmatmul.mubr.msk.bf16.vlgmr.msra.gmra.mrb[0].mxu0 %vm560_vm0, %v6222_v41 }
 0x1cd   : > { %v5511_v42 = vpop.f32.mrb[0].mxu1 }
 0x1ce   : > { %v2252_v43 = vpop.f32.mrb[1].mxu1 }
 0x1cf   : > { %v5512_v44 = vpop.f32.mrb[2].mxu1 }
 0x1d0   : > { %v2255_v45 = vpop.f32.mrb[3].mxu1 }
 0x1d5   : > { %v5515_v46 = vpop.f32.mrb[4].mxu1 }
 0x1d6   : > { %v5731_v47 = vpop.f32.mrb[4].mxu0  ;;  %v2268_v48 = vpop.f32.mrb[5].mxu1 }
 0x1d7   : > { %v5765_v49 = vadd.f32 %v5731_v47, %v5515_v46  ;;  %v4116_v50 = vpop.f32.mrb[5].mxu0  ;;  %v5516_v51 = vpop.f32.mrb[6].mxu1 }
 0x1d8   : > { %v5767_v52 = vadd.f32 %v4116_v50, %v2268_v48  ;;  %v5732_v53 = vpop.f32.mrb[6].mxu0  ;;  %v2271_v54 = vpop.f32.mrb[7].mxu1 }
 0x1d9   : > { %v5769_v55 = vadd.f32 %v5732_v53, %v5516_v51  ;;  %v4119_v56 = vpop.f32.mrb[7].mxu0 }
 0x1da   : > { %v5771_v57 = vadd.f32 %v4119_v56, %v2271_v54 }
 0x1e1   : > { %v5749_v59 = vpop.f32.mrb[8].mxu1 }
 0x1e2   : > { %v5745_v60 = vpop.f32.mrb[0].mxu0  ;;  %v5766_v61 = vadd.f32 %v5765_v49, %v5749_v59  ;;  %v4270_v62 = vpop.f32.mrb[9].mxu1 }
 0x1e3   : > { %v5761_v63 = vadd.f32 %v5745_v60, %v5511_v42  ;;  %v4254_v0 = vpop.f32.mrb[1].mxu0  ;;  %v5768_v1 = vadd.f32 %v5767_v52, %v4270_v62  ;;  %v5750_v2 = vpop.f32.mrb[10].mxu1 }
 0x1e4   : > { %v4306_v3 = vadd.f32 %v5766_v61, %v5073_v58  ;;  %v5762_v4 = vadd.f32 %v4254_v0, %v2252_v43  ;;  %v5746_v5 = vpop.f32.mrb[2].mxu0  ;;  %v5770_v6 = vadd.f32 %v5769_v55, %v5750_v2  ;;  %v4273_v7 = vpop.f32.mrb[11].mxu1 }
 0x1e5   : > { %v4302_v8 = vadd.f32 %v5761_v63, %v5073_v58  ;;  %v4304_v9 = vadd.f32 %v5768_v1, %v5073_v58  ;;  %v5763_v10 = vadd.f32 %v5746_v5, %v5512_v44  ;;  %v4257_v11 = vpop.f32.mrb[3].mxu0  ;;  %v5772_v12 = vadd.f32 %v5771_v57, %v4273_v7 }
 0x1e6   : > { %4314 = vst [vmem:[%s478_s16 + $0x30] sm:$0xff] %v4306_v3  ;;  %v4300_v13 = vadd.f32 %v5762_v4, %v5073_v58  ;;  %v4307_v14 = vadd.f32 %v5770_v6, %v5073_v58  ;;  %v5764_v15 = vadd.f32 %v4257_v11, %v2255_v45 }
 0x1e7   : > { %4310 = vst [vmem:[%s478_s16 + $0x10] sm:$0xff] %v4302_v8  ;;  %4312 = vst [vmem:[%s478_s16 + $0x20] sm:$0xff] %v4304_v9  ;;  %v4303_v16 = vadd.f32 %v5763_v10, %v5073_v58  ;;  %v4305_v17 = vadd.f32 %v5772_v12, %v5073_v58 }
 0x1e8   : > { %4308 = vst [vmem:[%s478_s16] sm:$0xff] %v4300_v13  ;;  %4315 = vst [vmem:[%s478_s16 + $0x38] sm:$0xff] %v4307_v14  ;;  %v4301_v18 = vadd.f32 %v5764_v15, %v5073_v58 }
 0x1e9   : > { %4311 = vst [vmem:[%s478_s16 + $0x18] sm:$0xff] %v4303_v16  ;;  %4313 = vst [vmem:[%s478_s16 + $0x28] sm:$0xff] %v4305_v17 }
 0x1ea   : > { %4309 = vst [vmem:[%s478_s16 + $0x8] sm:$0xff] %v4301_v18 }
 0x1eb PF: > { %s17_s28 = sadd.s32 1, %s6262_s28   ;;  %s7013_s24 = smov %s6254_s26 }
 0x1ec   : > { %p14_p12 = scmp.ge.s32.totalorder %s17_s28, 18   ;;  %s7014_s25 = smov %s6258_s27 }
 0x1ed   : > { %s7015_s26 = smov %s7018_s29  ;;  %s7016_s27 = smov %s7022_s30 }
 0x1ee   :  { %16 = sbr.rel (!%p14_p12) target bundleno = 3 (0x3), region = 114 }

</bundles_post_ra>
